<compile_context>
chip_gen: v5e
topology: v5e:2x2
jax: 0.10.0
libtpu: 0.0.40
codegen_flags: <defaults>
</compile_context>

<pallas_src>
import functools

import jax
import jax.numpy as jnp
from jax.experimental import pallas as pl
from jax.experimental.pallas import tpu as pltpu


# ----------------------------------------------------------------------------
# Kernel: one (batch-block, query-tile) of scaled dot-product attention.
#   q_ref   : (BB, TQ, d)     k_ref : (BB, Sk, d)     v_ref : (BB, Sk, dv)
#   ctx_ref : (BB, TQ, dv)    attn_ref : (BB, TQ, Sk)
# ----------------------------------------------------------------------------
def _dot_attention_kernel(q_ref, k_ref, v_ref, ctx_ref, attn_ref, *, scale):
    q = q_ref[...]
    k = k_ref[...]
    v = v_ref[...]

    # `if scale:` branch of the PyTorch forward; fold the scale into q so the
    # VPU multiply is O(TQ*d) instead of O(TQ*Sk) on the logits.
    if scale:
        q = q * jnp.float32(scale)

    # attention = bmm(q, k.transpose(1, 2)) : batched MXU matmul, f32 accumulate.
    logits = jax.lax.dot_general(
        q, k, (((2,), (2,)), ((0,), (0,))),
        preferred_element_type=jnp.float32)

    # TODO(synk): attn_mask / masked_fill path not implemented (reference call
    # uses attn_mask=None).

    # nn.Softmax(dim=2): numerically stable softmax over the key axis.
    m = jnp.max(logits, axis=-1, keepdims=True)
    e = jnp.exp(logits - m)
    denom = jnp.sum(e, axis=-1, keepdims=True)
    p = e * pl.reciprocal(denom, approx=False)   # one reciprocal per row, then mul

    # Dropout(p=0.0) is the identity -- nothing to do.
    attn_ref[...] = p.astype(attn_ref.dtype)

    # context = bmm(attention, v)
    ctx_ref[...] = jax.lax.dot_general(
        p, v, (((2,), (1,)), ((0,), (0,))),
        preferred_element_type=jnp.float32).astype(ctx_ref.dtype)


def _pick_block(total, target):
    """Largest tile == target if it divides `total`, else the full extent."""
    return target if (total >= target and total % target == 0) else total


# ----------------------------------------------------------------------------
# Python wrapper == dot_attention.forward(q, k, v, scale=None, attn_mask=None)
# ----------------------------------------------------------------------------
def dot_attention(q, k, v, scale=None, attn_mask=None, *, batch_block=2, q_tile=128):
    assert attn_mask is None  # TODO(synk): attn_mask path not supported.

    B, Sq, d = q.shape
    _, Sk, dv = v.shape

    BB = _pick_block(B, batch_block)
    TQ = _pick_block(Sq, q_tile)
    grid = (B // BB, Sq // TQ)

    q_spec = pl.BlockSpec((BB, TQ, d), lambda b, i: (b, i, 0))
    k_spec = pl.BlockSpec((BB, Sk, d), lambda b, i: (b, 0, 0))
    v_spec = pl.BlockSpec((BB, Sk, dv), lambda b, i: (b, 0, 0))
    ctx_spec = pl.BlockSpec((BB, TQ, dv), lambda b, i: (b, i, 0))
    attn_spec = pl.BlockSpec((BB, TQ, Sk), lambda b, i: (b, i, 0))

    scale_val = float(scale) if scale else 0.0  # mirrors PyTorch `if scale:` semantics

    ctx, attn = pl.pallas_call(
        functools.partial(_dot_attention_kernel, scale=scale_val),
        grid=grid,
        in_specs=[q_spec, k_spec, v_spec],
        out_specs=[ctx_spec, attn_spec],
        out_shape=[jax.ShapeDtypeStruct((B, Sq, dv), q.dtype),
                   jax.ShapeDtypeStruct((B, Sq, Sk), q.dtype)],
        compiler_params=pltpu.CompilerParams(
            dimension_semantics=("parallel", "parallel")),
    )(q, k, v)
    return ctx, attn


# ----------------------------------------------------------------------------
# Pure-JAX reference (sanity check).
# ----------------------------------------------------------------------------
def _reference(q, k, v, scale):
    logits = jnp.einsum("bqd,bkd->bqk", q, k)
    if scale:
        logits = logits * scale
    attn = jax.nn.softmax(logits, axis=2)
    ctx = jnp.einsum("bqk,bkd->bqd", attn, v)
    return ctx, attn


if __name__ == "__main__":
    # Small but lane-dense shapes: batch=4, seq=128, feature=64.
    B, Sq, Sk, d, dv = 4, 128, 128, 64, 64

    root = jax.random.PRNGKey(0)
    kq, kk, kv = jax.random.split(root, 3)
    q = jax.random.normal(kq, (B, Sq, d), jnp.float32)
    k = jax.random.normal(kk, (B, Sk, d), jnp.float32)
    v = jax.random.normal(kv, (B, Sk, dv), jnp.float32)
    scale = float(d) ** -0.5

    ctx, attn = jax.block_until_ready(dot_attention(q, k, v, scale))

    ref_ctx, ref_attn = _reference(q, k, v, scale)
    assert ctx.shape == (B, Sq, dv) and attn.shape == (B, Sq, Sk)
    assert jnp.allclose(attn, ref_attn, atol=1e-5, rtol=1e-5)
    assert jnp.allclose(ctx, ref_ctx, atol=1e-4, rtol=1e-4)

    print("KERNEL_OK")
</pallas_src>

<mosaic_0001>
module attributes {stable_mosaic.version = 11 : i64} {
  func.func @_dot_attention_kernel(%arg0: i32, %arg1: i32, %arg2: memref<2x128x64xf32, #tpu.memory_space<vmem>>, %arg3: memref<2x128x64xf32, #tpu.memory_space<vmem>>, %arg4: memref<2x128x64xf32, #tpu.memory_space<vmem>>, %arg5: memref<2x128x64xf32, #tpu.memory_space<vmem>>, %arg6: memref<2x128x128xf32, #tpu.memory_space<vmem>>) attributes {dimension_semantics = [#tpu.dimension_semantics<parallel>, #tpu.dimension_semantics<parallel>], iteration_bounds = array<i64: 2, 1>, scalar_prefetch = 0 : i64, scratch_operands = 0 : i64, tpu.core_type = #tpu.core_type<tc>, window_params = [{transform_indices = @transform_0, window_bounds = array<i64: 2, 128, 64>}, {transform_indices = @transform_1, window_bounds = array<i64: 2, 128, 64>}, {transform_indices = @transform_2, window_bounds = array<i64: 2, 128, 64>}, {transform_indices = @transform_3, window_bounds = array<i64: 2, 128, 64>}, {transform_indices = @transform_4, window_bounds = array<i64: 2, 128, 128>}]} {
    %c0 = arith.constant 0 : index
    %c0_0 = arith.constant 0 : index
    %c0_1 = arith.constant 0 : index
    %0 = vector.load %arg2[%c0, %c0_0, %c0_1] : memref<2x128x64xf32, #tpu.memory_space<vmem>>, vector<2x128x64xf32>
    %c0_2 = arith.constant 0 : index
    %c0_3 = arith.constant 0 : index
    %c0_4 = arith.constant 0 : index
    %1 = vector.load %arg3[%c0_2, %c0_3, %c0_4] : memref<2x128x64xf32, #tpu.memory_space<vmem>>, vector<2x128x64xf32>
    %c0_5 = arith.constant 0 : index
    %c0_6 = arith.constant 0 : index
    %c0_7 = arith.constant 0 : index
    %2 = vector.load %arg4[%c0_5, %c0_6, %c0_7] : memref<2x128x64xf32, #tpu.memory_space<vmem>>, vector<2x128x64xf32>
    %cst = arith.constant 1.250000e-01 : f32
    %3 = vector.broadcast %cst : f32 to vector<2x128x64xf32>
    %4 = arith.mulf %0, %3 : vector<2x128x64xf32>
    %cst_8 = arith.constant dense<0.000000e+00> : vector<2x128x128xf32>
    %5 = tpu.matmul %4, %1, %cst_8 {dimension_numbers = #tpu.dot_dimension_numbers<[2], [2], [1], [1], [0, 0, 0, 1, 1, 1], [0], [0]>} : vector<2x128x64xf32>, vector<2x128x64xf32>, vector<2x128x128xf32> -> vector<2x128x128xf32>
    %cst_9 = arith.constant dense<0xFF800000> : vector<2x128xf32>
    %6 = vector.multi_reduction <maximumf>, %5, %cst_9 [2] : vector<2x128x128xf32> to vector<2x128xf32>
    %7 = vector.shape_cast %6 : vector<2x128xf32> to vector<2x128x1xf32>
    %8 = vector.broadcast %7 : vector<2x128x1xf32> to vector<2x128x128xf32>
    %9 = arith.subf %5, %8 : vector<2x128x128xf32>
    %10 = math.exp %9 : vector<2x128x128xf32>
    %cst_10 = arith.constant dense<0.000000e+00> : vector<2x128xf32>
    %11 = vector.multi_reduction <add>, %10, %cst_10 [2] : vector<2x128x128xf32> to vector<2x128xf32>
    %12 = vector.shape_cast %11 : vector<2x128xf32> to vector<2x128x1xf32>
    %13 = tpu.reciprocal %12 : vector<2x128x1xf32> -> vector<2x128x1xf32>
    %14 = vector.broadcast %13 : vector<2x128x1xf32> to vector<2x128x128xf32>
    %15 = arith.mulf %10, %14 : vector<2x128x128xf32>
    %c0_11 = arith.constant 0 : index
    %c0_12 = arith.constant 0 : index
    %c0_13 = arith.constant 0 : index
    %16 = vector.load %arg6[%c0_11, %c0_12, %c0_13] : memref<2x128x128xf32, #tpu.memory_space<vmem>>, vector<2x128x128xf32>
    tpu.vector_store %arg6[%c0_11, %c0_12, %c0_13], %15 {strides = array<i32>} : memref<2x128x128xf32, #tpu.memory_space<vmem>>, vector<2x128x128xf32>,
    %cst_14 = arith.constant dense<0.000000e+00> : vector<2x128x64xf32>
    %17 = tpu.matmul %15, %2, %cst_14 {dimension_numbers = #tpu.dot_dimension_numbers<[2], [1], [1], [2], [0, 0, 0, 1, 1, 2], [0], [0]>} : vector<2x128x128xf32>, vector<2x128x64xf32>, vector<2x128x64xf32> -> vector<2x128x64xf32>
    %c0_15 = arith.constant 0 : index
    %c0_16 = arith.constant 0 : index
    %c0_17 = arith.constant 0 : index
    %18 = vector.load %arg5[%c0_15, %c0_16, %c0_17] : memref<2x128x64xf32, #tpu.memory_space<vmem>>, vector<2x128x64xf32>
    tpu.vector_store %arg5[%c0_15, %c0_16, %c0_17], %17 {strides = array<i32>} : memref<2x128x64xf32, #tpu.memory_space<vmem>>, vector<2x128x64xf32>,
    return
  }
  func.func @transform_0(%arg0: i32, %arg1: i32) -> (i32, i32, i32) {
    %c0_i32 = arith.constant 0 : i32
    %c0_i32_0 = arith.constant 0 : i32
    return %arg0, %arg1, %c0_i32 : i32, i32, i32
  }
  func.func @transform_1(%arg0: i32, %arg1: i32) -> (i32, i32, i32) {
    %c0_i32 = arith.constant 0 : i32
    %c0_i32_0 = arith.constant 0 : i32
    %c0_i32_1 = arith.constant 0 : i32
    return %arg0, %c0_i32, %c0_i32_0 : i32, i32, i32
  }
  func.func @transform_2(%arg0: i32, %arg1: i32) -> (i32, i32, i32) {
    %c0_i32 = arith.constant 0 : i32
    %c0_i32_0 = arith.constant 0 : i32
    %c0_i32_1 = arith.constant 0 : i32
    return %arg0, %c0_i32, %c0_i32_0 : i32, i32, i32
  }
  func.func @transform_3(%arg0: i32, %arg1: i32) -> (i32, i32, i32) {
    %c0_i32 = arith.constant 0 : i32
    %c0_i32_0 = arith.constant 0 : i32
    return %arg0, %arg1, %c0_i32 : i32, i32, i32
  }
  func.func @transform_4(%arg0: i32, %arg1: i32) -> (i32, i32, i32) {
    %c0_i32 = arith.constant 0 : i32
    %c0_i32_0 = arith.constant 0 : i32
    return %arg0, %arg1, %c0_i32 : i32, i32, i32
  }
}

</mosaic_0001>

<bundles_post_ra>
// kernel: tpu_custom_call.1
= control target key start
LH: loop header
LB: loop body
LE: loop exit
PB: predicated region body
PF: predicated region fallthrough
CT: control target
= control target key end

     0   :  { %10 = vsyncpa [#allocation3], 0  ;;  %s3224_s0 = inlined_call_operand.vmem [shape: f32[4,128,64], index: 0, kind: input, shape index: {}]   ;;  %s3225_s1 = inlined_call_operand.vmem [shape: f32[4,128,64], index: 1, kind: input, shape index: {}]   ;;  %s3226_s2 = inlined_call_operand.vmem [shape: f32[4,128,64], index: 2, kind: input, shape index: {}]   ;;  %s3227_s3 = inlined_call_operand.vmem [shape: f32[4,128,64], index: 3, kind: output, shape index: {0}]   ;;  %s3228_s4 = inlined_call_operand.hbm [shape: f32[4,128,128], index: 4, kind: output, shape index: {1}]  }
   0x1   :  { %12 = vsyncpa [#allocation3 + $0x1], 0  ;;  %s2220_s15 = smov 0   ;;  %s2222_s16 = smov 0  }
   0x2   :  { %s2224_s17 = smov 0   ;;  %s2226_s18 = smov 0  }
   0x3   :  { %s2228_s19 = smov 0   ;;  %s2230_s20 = smov 0  }
   0x4 LB: > { %s1834_s21 = sadd.s32 4294967295, %s2191_s20   ;;  %s1835_s22 = sadd.s32 4294967294, %s2191_s20   ;;  %s2191_s20 = sphi %s2230_s20, %s18_s20   ;;  %s2187_s19 = sphi %s2228_s19, %s3283_s19   ;;  %s2183_s18 = sphi %s2226_s18, %s3282_s18   ;;  %s2179_s17 = sphi %s2224_s17, %s3281_s17   ;;  %s2175_s16 = sphi %s2222_s16, %s3280_s16   ;;  %s2171_s15 = sphi %s2220_s15, %s3279_s15  }
   0x5   : > { %s30_s23 = sadd.s32 1, %s2187_s19  ;;  %s147_s24 = sadd.s32 1, %s2179_s17 }
   0x6   : > { %p32_p0 = scmp.ge.s32.totalorder %s30_s23, 2  ;;  %p157_p1 = scmp.ne.s32.totalorder %s2179_s17, %s2175_s16 }
   0x7   : > { %p158_p2 = scmp.eq.s32.totalorder %s1834_s21, 1  ;;  %p163_p3 = scmp.ne.s32.totalorder %s2175_s16, %s2171_s15 }
   0x8   : > { %s3285_s23 = smov (%p32_p0, %s30_s23), 0  ;;  %p164_p5 = scmp.eq.s32.totalorder %s1835_s22, 1 }
   0x9   : > { %p2260_p4 = por %p158_p2, %p157_p1  ;;  %s142_s26 = ssub.s32 %s2187_s19, %s3285_s23 }
   0xa   : > { %p1838_p6 = scmp.ge.s32.totalorder %s2191_s20, 1  ;;  %p145_p7 = scmp.eq.s32.totalorder %s142_s26, 0 }
   0xb   : > { %p2267_p8 = por %p164_p5, %p163_p3  ;;  %p217_p9 = scmp.lt.s32.totalorder %s2191_s20, 3 }
   0xc   : > { %s2273_s28 = scalar_select %p145_p7, %s2179_s17, %s147_s24  }
   0xd   : > { %p218_p10 = pnand %p1838_p6, %p217_p9 }
   0xe   : > { %s1840_s29 = sshll.u32 (!%p218_p10), %s2183_s18, 1  ;;  %s267_s14 = sand.u32 (!%p218_p10), 1, %s2175_s16  }
   0xf   : > { %221 = sbr.rel (%p218_p10) target bundleno = 817 (0x331), region = 32  ;;  %p272_p11 = scmp.lt.s32.totalorder (!%p218_p10), %s1840_s29, 3 }
  0x10   : > { %s1839_s21 = sshll.u32 (!%p218_p10), %s267_s14, 8 }
  0x11   : > { %s2650_s22 = scalar_lea.vmem (!%p218_p10), [#allocation2], %s1839_s21 }
  0x12   : > { %s1690_s8 = sshll.u32 (!%p218_p10), %s2650_s22, 4  ;;  %s1691_s8 = int_to_ptr.vmem [resolvable:$true] %s1690_s8 }
  0x14   : > { %s3287_s29 = smov (!%p272_p11, %s1840_s29), 3  ;;  %vm438_vm0 = vcmask 523264  }
  0x15   : > { %s2276_s30 = sshll.u32 %s3287_s29, 7 }
  0x16   : > { %s2282_s7 = scalar_lea.vmem %s3225_s1, %s2276_s30  ;;  %s2346_s10 = scalar_lea.vmem %s3224_s0, %s2276_s30 }
  0x17   : > { %v357_v0 = vld [vmem:[%s2282_s7 + $0x78] sm:$0xff]  ;;  %v356_v2 = vld [vmem:[%s2282_s7 + $0x70] sm:$0xff]  ;;  %v355_v4 = vld [vmem:[%s2282_s7 + $0x68] sm:$0xff]  ;;  %s2557_s13 = scalar_lea.vmem %s3226_s2, %s2276_s30  ;;  %s3086_s29 = scalar_lea.vmem %s3227_s3, %s2276_s30 }
  0x18   : > { %v373_v1 = vld [vmem:[%s2282_s7 + $0xf8] sm:$0xff]  ;;  %1852 = vmatpush.xpose.msk.msra.mxu0 %vm438_vm0, %v357_v0  ;;  %v372_v3 = vld [vmem:[%s2282_s7 + $0xf0] sm:$0xff]  ;;  %v371_v5 = vld [vmem:[%s2282_s7 + $0xe8] sm:$0xff]  ;;  %s1927_s30 = sshll.u32 %s2183_s18, 8  ;;  %s2133_s18 = scalar_lea.hbm %s3228_s4, 512 }
  0x19   : > { %1884 = vmatpush.xpose.msk.msra.mxu1 %vm438_vm0, %v373_v1  ;;  %v354_v6 = vld [vmem:[%s2282_s7 + $0x60] sm:$0xff]  ;;  %v353_v8 = vld [vmem:[%s2282_s7 + $0x58] sm:$0xff]  ;;  %v352_v10 = vld [vmem:[%s2282_s7 + $0x50] sm:$0xff] }
  0x1a   : > { %v370_v7 = vld [vmem:[%s2282_s7 + $0xe0] sm:$0xff]  ;;  %v369_v9 = vld [vmem:[%s2282_s7 + $0xd8] sm:$0xff]  ;;  %v368_v11 = vld [vmem:[%s2282_s7 + $0xd0] sm:$0xff] }
  0x1b   : > { %v351_v12 = vld [vmem:[%s2282_s7 + $0x48] sm:$0xff]  ;;  %v350_v14 = vld [vmem:[%s2282_s7 + $0x40] sm:$0xff]  ;;  %v349_v16 = vld [vmem:[%s2282_s7 + $0x38] sm:$0xff] }
  0x1c   : > { %1853 = vmatpush.xpose.msk.msra.mxu0 %vm438_vm0, %v356_v2  ;;  %v367_v13 = vld [vmem:[%s2282_s7 + $0xc8] sm:$0xff]  ;;  %v366_v15 = vld [vmem:[%s2282_s7 + $0xc0] sm:$0xff]  ;;  %v365_v17 = vld [vmem:[%s2282_s7 + $0xb8] sm:$0xff] }
  0x1d   : > { %1885 = vmatpush.xpose.msk.msra.mxu1 %vm438_vm0, %v372_v3  ;;  %v348_v18 = vld [vmem:[%s2282_s7 + $0x30] sm:$0xff]  ;;  %v347_v20 = vld [vmem:[%s2282_s7 + $0x28] sm:$0xff]  ;;  %v346_v22 = vld [vmem:[%s2282_s7 + $0x20] sm:$0xff] }
  0x1e   : > { %v364_v19 = vld [vmem:[%s2282_s7 + $0xb0] sm:$0xff]  ;;  %v363_v21 = vld [vmem:[%s2282_s7 + $0xa8] sm:$0xff]  ;;  %v362_v23 = vld [vmem:[%s2282_s7 + $0xa0] sm:$0xff] }
  0x1f   : > { %v345_v24 = vld [vmem:[%s2282_s7 + $0x18] sm:$0xff]  ;;  %v344_v26 = vld [vmem:[%s2282_s7 + $0x10] sm:$0xff]  ;;  %v343_v28 = vld [vmem:[%s2282_s7 + $0x8] sm:$0xff] }
  0x20   : > { %1854 = vmatpush.xpose.msk.msra.mxu0 %vm438_vm0, %v355_v4  ;;  %v361_v25 = vld [vmem:[%s2282_s7 + $0x98] sm:$0xff]  ;;  %v360_v27 = vld [vmem:[%s2282_s7 + $0x90] sm:$0xff]  ;;  %v359_v29 = vld [vmem:[%s2282_s7 + $0x88] sm:$0xff] }
  0x21   : > { %1886 = vmatpush.xpose.msk.msra.mxu1 %vm438_vm0, %v371_v5  ;;  %v310_v30 = vld [vmem:[%s2346_s10] sm:$0xff]  ;;  %v311_v36 = vld [vmem:[%s2346_s10 + $0x8] sm:$0xff]  ;;  %v312_v40 = vld [vmem:[%s2346_s10 + $0x10] sm:$0xff] }
  0x22   : > { %v326_v31 = vld [vmem:[%s2346_s10 + $0x80] sm:$0xff]  ;;  %v406_v34 = vmul.f32 0.125, %v310_v30  ;;  %v327_v37 = vld [vmem:[%s2346_s10 + $0x88] sm:$0xff]  ;;  %v407_v38 = vmul.f32 0.125, %v311_v36  ;;  %v328_v41 = vld [vmem:[%s2346_s10 + $0x90] sm:$0xff]  ;;  %v408_v42 = vmul.f32 0.125, %v312_v40 }
  0x23   : > { %v342_v32 = vld [vmem:[%s2282_s7] sm:$0xff]  ;;  %v422_v35 = vmul.f32 0.125, %v326_v31  ;;  %v423_v39 = vmul.f32 0.125, %v327_v37  ;;  %v424_v43 = vmul.f32 0.125, %v328_v41  ;;  %v313_v44 = vld [vmem:[%s2346_s10 + $0x18] sm:$0xff]  ;;  %v315_v52 = vld [vmem:[%s2346_s10 + $0x28] sm:$0xff] }
  0x24   : > { %1855 = vmatpush.xpose.msk.msra.mxu0 %vm438_vm0, %v354_v6  ;;  %v358_v33 = vld [vmem:[%s2282_s7 + $0x80] sm:$0xff]  ;;  %v329_v45 = vld [vmem:[%s2346_s10 + $0x98] sm:$0xff]  ;;  %v409_v46 = vmul.f32 0.125, %v313_v44  ;;  %v331_v53 = vld [vmem:[%s2346_s10 + $0xa8] sm:$0xff]  ;;  %v411_v54 = vmul.f32 0.125, %v315_v52  ;;  %s1689_s7 = scalar_lea.hbm %s3228_s4, %s1927_s30 }
  0x25   : > { %1887 = vmatpush.xpose.msk.msra.mxu1 %vm438_vm0, %v370_v7  ;;  %v425_v47 = vmul.f32 0.125, %v329_v45  ;;  %v314_v48 = vld [vmem:[%s2346_s10 + $0x20] sm:$0xff]  ;;  %v427_v55 = vmul.f32 0.125, %v331_v53  ;;  %v316_v56 = vld [vmem:[%s2346_s10 + $0x30] sm:$0xff]  ;;  %v317_v60 = vld [vmem:[%s2346_s10 + $0x38] sm:$0xff]  ;;  %s1692_s9 = sshll.u32 %s1689_s7, 4  ;;  %s1693_s9 = int_to_ptr.hbm [resolvable:$true] %s1692_s9 }
  0x26   : > { %v330_v49 = vld [vmem:[%s2346_s10 + $0xa0] sm:$0xff]  ;;  %v410_v50 = vmul.f32 0.125, %v314_v48  ;;  %v332_v57 = vld [vmem:[%s2346_s10 + $0xb0] sm:$0xff]  ;;  %v412_v58 = vmul.f32 0.125, %v316_v56  ;;  %v333_v61 = vld [vmem:[%s2346_s10 + $0xb8] sm:$0xff]  ;;  %v413_v62 = vmul.f32 0.125, %v317_v60 }
  0x27   : > { %v426_v51 = vmul.f32 0.125, %v330_v49  ;;  %v428_v59 = vmul.f32 0.125, %v332_v57  ;;  %v429_v63 = vmul.f32 0.125, %v333_v61  ;;  %v318_v0 = vld [vmem:[%s2346_s10 + $0x40] sm:$0xff]  ;;  %v319_v4 = vld [vmem:[%s2346_s10 + $0x48] sm:$0xff]  ;;  %s2127_s11 = sshra.s32 %s1693_s9, 4  ;;  %s2128_s11 = int_to_ptr.hbm [resolvable:$true] %s2127_s11 }
  0x28   : > { %1856 = vmatpush.xpose.msk.msra.mxu0 %vm438_vm0, %v353_v8  ;;  %v334_v1 = vld [vmem:[%s2346_s10 + $0xc0] sm:$0xff]  ;;  %v414_v2 = vmul.f32 0.125, %v318_v0  ;;  %v335_v5 = vld [vmem:[%s2346_s10 + $0xc8] sm:$0xff]  ;;  %v415_v6 = vmul.f32 0.125, %v319_v4  ;;  %v320_v8 = vld [vmem:[%s2346_s10 + $0x50] sm:$0xff]  ;;  %s2129_s12 = scalar_lea.hbm %s2128_s11, 256  ;;  %p2134_p1 = scmp.lt.s32.totalorder %s2128_s11, %s3228_s4 }
  0x29   : > { %1888 = vmatpush.xpose.msk.msra.mxu1 %vm438_vm0, %v369_v9  ;;  %v430_v3 = vmul.f32 0.125, %v334_v1  ;;  %v431_v7 = vmul.f32 0.125, %v335_v5  ;;  %v336_v9 = vld [vmem:[%s2346_s10 + $0xd0] sm:$0xff]  ;;  %v323_v30 = vld [vmem:[%s2346_s10 + $0x68] sm:$0xff]  ;;  %p2130_p12 = scmp.ne.s32.totalorder %s2128_s11, %s2129_s12  ;;  %p2135_p2 = scmp.lt.s32.totalorder %s2133_s18, %s2129_s12 }
  0x2a   : > { %v419_v31 = vmul.f32 0.125, %v323_v30 }
  0x2b   : > { %p2131_p13 = pnand %p2130_p12, %p2260_p4  ;;  %p2136_p3 = por %p2135_p2, %p2134_p1 }
  0x2c   : > { %1857 = vmatpush.xpose.msk.msra.mxu0 %vm438_vm0, %v352_v10  ;;  %v416_v10 = vmul.f32 0.125, %v320_v8 }
  0x2d   : > { %1889 = vmatpush.xpose.msk.msra.mxu1 %vm438_vm0, %v368_v11  ;;  %v432_v11 = vmul.f32 0.125, %v336_v9  ;;  %p2132_p0 = pneg %p2131_p13 }
  0x2f   : > { %p2137_p5 = pnand %p2136_p3, %p2132_p0 }
  0x30   : > { %1858 = vmatpush.xpose.msk.msra.mxu0 %vm438_vm0, %v351_v12  ;;  %v321_v12 = vld [vmem:[%s2346_s10 + $0x58] sm:$0xff] }
  0x31   : > { %1890 = vmatpush.xpose.msk.msra.mxu1 %vm438_vm0, %v367_v13  ;;  %v417_v13 = vmul.f32 0.125, %v321_v12 }
  0x34   : > { %1859 = vmatpush.xpose.msk.msra.mxu0 %vm438_vm0, %v350_v14  ;;  %v337_v14 = vld [vmem:[%s2346_s10 + $0xd8] sm:$0xff] }
  0x35   : > { %1891 = vmatpush.xpose.msk.msra.mxu1 %vm438_vm0, %v366_v15  ;;  %v433_v15 = vmul.f32 0.125, %v337_v14 }
  0x38   : > { %1860 = vmatpush.xpose.msk.msra.mxu0 %vm438_vm0, %v349_v16 }
  0x39   : > { %1892 = vmatpush.xpose.msk.msra.mxu1 %vm438_vm0, %v365_v17 }
  0x3c   : > { %1861 = vmatpush.xpose.msk.msra.mxu0 %vm438_vm0, %v348_v18  ;;  %v338_v18 = vld [vmem:[%s2346_s10 + $0xe0] sm:$0xff] }
  0x3d   : > { %1893 = vmatpush.xpose.msk.msra.mxu1 %vm438_vm0, %v364_v19  ;;  %v434_v19 = vmul.f32 0.125, %v338_v18 }
  0x40   : > { %1862 = vmatpush.xpose.msk.msra.mxu0 %vm438_vm0, %v347_v20 }
  0x41   : > { %1894 = vmatpush.xpose.msk.msra.mxu1 %vm438_vm0, %v363_v21 }
  0x44   : > { %1863 = vmatpush.xpose.msk.msra.mxu0 %vm438_vm0, %v346_v22  ;;  %v339_v22 = vld [vmem:[%s2346_s10 + $0xe8] sm:$0xff] }
  0x45   : > { %1895 = vmatpush.xpose.msk.msra.mxu1 %vm438_vm0, %v362_v23  ;;  %v435_v23 = vmul.f32 0.125, %v339_v22 }
  0x48   : > { %1864 = vmatpush.xpose.msk.msra.mxu0 %vm438_vm0, %v345_v24 }
  0x49   : > { %1896 = vmatpush.xpose.msk.msra.mxu1 %vm438_vm0, %v361_v25 }
  0x4c   : > { %1865 = vmatpush.xpose.msk.msra.mxu0 %vm438_vm0, %v344_v26  ;;  %v322_v26 = vld [vmem:[%s2346_s10 + $0x60] sm:$0xff] }
  0x4d   : > { %1897 = vmatpush.xpose.msk.msra.mxu1 %vm438_vm0, %v360_v27  ;;  %v418_v27 = vmul.f32 0.125, %v322_v26 }
  0x50   : > { %1866 = vmatpush.xpose.msk.msra.mxu0 %vm438_vm0, %v343_v28 }
  0x51   : > { %1898 = vmatpush.xpose.msk.msra.mxu1 %vm438_vm0, %v359_v29 }
  0x54   : > { %1867 = vmatpush.xpose.msk.msra.mxu0 %vm438_vm0, %v342_v32 }
  0x55   : > { %1899 = vmatpush.xpose.msk.msra.mxu1 %vm438_vm0, %v358_v33 }
  0x57   : > { %1868 = vmatmul.msk.f32.vlgmr.msra.gmra.mxu0 %vm438_vm0, %v406_v34  ;;  %v324_v34 = vld [vmem:[%s2346_s10 + $0x70] sm:$0xff] }
  0x58   : > { %1900 = vmatmul.msk.f32.vlgmr.msra.gmra.mxu1 %vm438_vm0, %v422_v35  ;;  %v420_v35 = vmul.f32 0.125, %v324_v34 }
  0x5f   : > { %1869 = vmatmul.msk.f32.gmra.mxu0 %vm438_vm0, %v407_v38  ;;  %v340_v38 = vld [vmem:[%s2346_s10 + $0xf0] sm:$0xff] }
  0x60   : > { %1901 = vmatmul.msk.f32.gmra.mxu1 %vm438_vm0, %v423_v39  ;;  %v436_v39 = vmul.f32 0.125, %v340_v38 }
  0x67   : > { %1870 = vmatmul.msk.f32.gmra.mxu0 %vm438_vm0, %v408_v42  ;;  %v325_v42 = vld [vmem:[%s2346_s10 + $0x78] sm:$0xff] }
  0x68   : > { %1902 = vmatmul.msk.f32.gmra.mxu1 %vm438_vm0, %v424_v43  ;;  %v341_v43 = vld [vmem:[%s2346_s10 + $0xf8] sm:$0xff]  ;;  %v421_v44 = vmul.f32 0.125, %v325_v42  ;;  %s1670_s10 = scalar_lea.sflag [#allocation3], %s267_s14 }
  0x69   : > { %v437_v45 = vmul.f32 0.125, %v341_v43 }
  0x6f   : > { %1871 = vmatmul.msk.f32.gmra.mxu0 %vm438_vm0, %v409_v46 }
  0x70   : > { %1903 = vmatmul.msk.f32.gmra.mxu1 %vm438_vm0, %v425_v47 }
  0x77   : > { %1872 = vmatmul.msk.f32.gmra.mxu0 %vm438_vm0, %v410_v50 }
  0x78   : > { %1904 = vmatmul.msk.f32.gmra.mxu1 %vm438_vm0, %v426_v51 }
  0x7f   : > { %1873 = vmatmul.msk.f32.gmra.mxu0 %vm438_vm0, %v411_v54 }
  0x80   : > { %1905 = vmatmul.msk.f32.gmra.mxu1 %vm438_vm0, %v427_v55 }
  0x87   : > { %1874 = vmatmul.msk.f32.gmra.mxu0 %vm438_vm0, %v412_v58 }
  0x88   : > { %1906 = vmatmul.msk.f32.gmra.mxu1 %vm438_vm0, %v428_v59 }
  0x8f   : > { %1875 = vmatmul.msk.f32.gmra.mxu0 %vm438_vm0, %v413_v62 }
  0x90   : > { %1907 = vmatmul.msk.f32.gmra.mxu1 %vm438_vm0, %v429_v63 }
  0x97   : > { %1876 = vmatmul.msk.f32.gmra.mxu0 %vm438_vm0, %v414_v2 }
  0x98   : > { %1908 = vmatmul.msk.f32.gmra.mxu1 %vm438_vm0, %v430_v3 }
  0x9f   : > { %1877 = vmatmul.msk.f32.gmra.mxu0 %vm438_vm0, %v415_v6 }
  0xa0   : > { %1909 = vmatmul.msk.f32.gmra.mxu1 %vm438_vm0, %v431_v7 }
  0xa7   : > { %1878 = vmatmul.msk.f32.gmra.mxu0 %vm438_vm0, %v416_v10 }
  0xa8   : > { %1910 = vmatmul.msk.f32.gmra.mxu1 %vm438_vm0, %v432_v11 }
  0xaf   : > { %1879 = vmatmul.msk.f32.gmra.mxu0 %vm438_vm0, %v417_v13 }
  0xb0   : > { %1911 = vmatmul.msk.f32.gmra.mxu1 %vm438_vm0, %v433_v15 }
  0xb7   : > { %1880 = vmatmul.msk.f32.gmra.mxu0 %vm438_vm0, %v418_v27 }
  0xb8   : > { %1912 = vmatmul.msk.f32.gmra.mxu1 %vm438_vm0, %v434_v19 }
  0xbf   : > { %1881 = vmatmul.msk.f32.gmra.mxu0 %vm438_vm0, %v419_v31 }
  0xc0   : > { %1913 = vmatmul.msk.f32.gmra.mxu1 %vm438_vm0, %v435_v23 }
  0xc7   : > { %1882 = vmatmul.msk.f32.gmra.mxu0 %vm438_vm0, %v420_v35 }
  0xc8   : > { %1914 = vmatmul.msk.f32.gmra.mxu1 %vm438_vm0, %v436_v39 }
  0xcf   : > { %1883 = vmatmul.msk.f32.gmra.mxu0 %vm438_vm0, %v421_v44 }
  0xd0   : > { %1915 = vmatmul.msk.f32.gmra.mxu1 %vm438_vm0, %v437_v45 }
  0xd4   : > { %v2402_v16 = vpop.f32.mrf.mxu0 }
  0xd5   : > { %v2404_v17 = vpop.f32.mrf.mxu1  ;;  %761 = vmax.xlane.f32.xlu0 %v2402_v16 }
  0xdc   : > { %v2409_v20 = vpop.f32.mrf.mxu0 }
  0xdd   : > { %v2411_v21 = vpop.f32.mrf.mxu1  ;;  %793 = vmax.xlane.f32.xlu0 %v2404_v17  ;;  %763 = vmax.xlane.f32.xlu1 %v2409_v20 }
  0xe4   : > { %v2417_v24 = vpop.f32.mrf.mxu0 }
  0xe5   : > { %v2419_v25 = vpop.f32.mrf.mxu1  ;;  %795 = vmax.xlane.f32.xlu1 %v2411_v21  ;;  %765 = vmax.xlane.f32.xlu2 %v2417_v24 }
  0xec   : > { %v2425_v28 = vpop.f32.mrf.mxu0 }
  0xed   : > { %v2427_v29 = vpop.f32.mrf.mxu1  ;;  %797 = vmax.xlane.f32.xlu2 %v2419_v25  ;;  %767 = vmax.xlane.f32.xlu0 %v2425_v28 }
  0xee   : > { %799 = vmax.xlane.f32.xlu1 %v2427_v29 }
  0xf4   : > { %v2434_v32 = vpop.f32.mrf.mxu0 }
  0xf5   : > { %v2436_v33 = vpop.f32.mrf.mxu1  ;;  %769 = vmax.xlane.f32.xlu2 %v2434_v32 }
  0xf6   : > { %801 = vmax.xlane.f32.xlu0 %v2436_v33 }
  0xfc   : > { %v2442_v36 = vpop.f32.mrf.mxu0 }
  0xfd   : > { %v2444_v37 = vpop.f32.mrf.mxu1  ;;  %771 = vmax.xlane.f32.xlu1 %v2442_v36 }
  0xfe   : > { %803 = vmax.xlane.f32.xlu2 %v2444_v37 }
 0x104   : > { %v2450_v40 = vpop.f32.mrf.mxu0 }
 0x105   : > { %v2452_v41 = vpop.f32.mrf.mxu1  ;;  %773 = vmax.xlane.f32.xlu0 %v2450_v40 }
 0x106   : > { %805 = vmax.xlane.f32.xlu1 %v2452_v41 }
 0x10c   : > { %v2460_v46 = vpop.f32.mrf.mxu0 }
 0x10d   : > { %v2462_v47 = vpop.f32.mrf.mxu1 }
 0x10e   : > { %807 = vmax.xlane.f32.xlu2 %v2462_v47  ;;  %775 = vmax.xlane.f32.xlu1 %v2460_v46 }
 0x114   : > { %v2466_v48 = vpop.f32.mrf.mxu0 }
 0x115   : > { %v2468_v49 = vpop.f32.mrf.mxu1 }
 0x116   : > { %809 = vmax.xlane.f32.xlu0 %v2468_v49  ;;  %777 = vmax.xlane.f32.xlu2 %v2466_v48 }
 0x11c   : > { %v2472_v50 = vpop.f32.mrf.mxu0 }
 0x11d   : > { %v2474_v51 = vpop.f32.mrf.mxu1 }
 0x11e   : > { %811 = vmax.xlane.f32.xlu1 %v2474_v51  ;;  %779 = vmax.xlane.f32.xlu0 %v2472_v50 }
 0x124   : > { %v2478_v52 = vpop.f32.mrf.mxu0 }
 0x125   : > { %v2480_v53 = vpop.f32.mrf.mxu1 }
 0x126   : > { %813 = vmax.xlane.f32.xlu2 %v2480_v53  ;;  %781 = vmax.xlane.f32.xlu1 %v2478_v52 }
 0x12c   : > { %v2491_v3 = vpop.f32.mrf.mxu0 }
 0x148   : > { %v762_v54 = vpop.xlane.xlu0 %761 }
 0x149   : > { %v825_v55 = vsub.f32 %v2402_v16, %v762_v54  ;;  %v2540_v54 = vpop.f32.mrf.mxu0 }
 0x14b   : > { %v857_v56 = vmul.f32 1.442695, %v825_v55 }
 0x14d   : > { %1985 = vpow2.f32 %v857_v56 }
 0x150   : > { %v794_v57 = vpop.xlane.xlu0 %793  ;;  %v764_v58 = vpop.xlane.xlu1 %763 }
 0x151   : > { %v841_v59 = vsub.f32 %v2404_v17, %v794_v57  ;;  %v826_v62 = vsub.f32 %v2409_v20, %v764_v58  ;;  %v2507_v17 = vpop.f32.mrf.mxu1 }
 0x153   : > { %v2486_v60 = vpop.eup %1985  ;;  %v889_v61 = vmul.f32 1.442695, %v841_v59  ;;  %v859_v63 = vmul.f32 1.442695, %v826_v62 }
 0x154   : > { %921 = vadd.xlane.f32.xlu2 %v2486_v60 }
 0x155   : > { %1987 = vpow2.f32 %v889_v61 }
 0x156   : > { %1989 = vpow2.f32 %v859_v63  ;;  %v2551_v63 = vpop.f32.mrf.mxu0 }
 0x158   : > { %v796_v0 = vpop.xlane.xlu1 %795  ;;  %v766_v1 = vpop.xlane.xlu2 %765 }
 0x159   : > { %v842_v2 = vsub.f32 %v2411_v21, %v796_v0  ;;  %v827_v6 = vsub.f32 %v2417_v24, %v766_v1 }
 0x15b   : > { %v2493_v4 = vpop.eup %1987  ;;  %v891_v5 = vmul.f32 1.442695, %v842_v2  ;;  %v861_v8 = vmul.f32 1.442695, %v827_v6  ;;  %v389_v6 = vld [vmem:[%s2557_s13 + $0x78] sm:$0xff] }
 0x15c   : > { %953 = vadd.xlane.f32.xlu0 %v2493_v4  ;;  %783 = vmax.xlane.f32.xlu2 %v2491_v3  ;;  %v2499_v11 = vpop.eup %1989 }
 0x15d   : > { %1991 = vpow2.f32 %v891_v5  ;;  %1497 = vmatpush.msra.mxu2 %v389_v6  ;;  %v399_v6 = vld [vmem:[%s2557_s13 + $0xc8] sm:$0xff] }
 0x15e   : > { %1993 = vpow2.f32 %v861_v8 }
 0x160   : > { %v798_v7 = vpop.xlane.xlu2 %797  ;;  %v768_v10 = vpop.xlane.xlu0 %767 }
 0x161   : > { %v843_v9 = vsub.f32 %v2419_v25, %v798_v7  ;;  %v800_v12 = vpop.xlane.xlu1 %799  ;;  %v828_v16 = vsub.f32 %v2425_v28, %v768_v10  ;;  %v2518_v28 = vpop.f32.mrf.mxu1  ;;  %v388_v7 = vld [vmem:[%s2557_s13 + $0x70] sm:$0xff]  ;;  %v387_v10 = vld [vmem:[%s2557_s13 + $0x68] sm:$0xff] }
 0x162   : > { %v844_v15 = vsub.f32 %v2427_v29, %v800_v12  ;;  %v404_v12 = vld [vmem:[%s2557_s13 + $0xf0] sm:$0xff]  ;;  %1498 = vmatpush.msra.mxu2 %v388_v7  ;;  %v378_v7 = vld [vmem:[%s2557_s13 + $0x20] sm:$0xff] }
 0x163   : > { %v2501_v13 = vpop.eup %1991  ;;  %v893_v14 = vmul.f32 1.442695, %v843_v9  ;;  %v863_v20 = vmul.f32 1.442695, %v828_v16  ;;  %v405_v9 = vld [vmem:[%s2557_s13 + $0xf8] sm:$0xff] }
 0x164   : > { %923 = vadd.xlane.f32.xlu0 %v2499_v11  ;;  %955 = vadd.xlane.f32.xlu1 %v2501_v13  ;;  %v895_v18 = vmul.f32 1.442695, %v844_v15  ;;  %v2509_v22 = vpop.eup %1993 }
 0x165   : > { %1995 = vpow2.f32 %v893_v14  ;;  %1562 = vmatpush.msra.mxu3 %v405_v9  ;;  %1499 = vmatpush.msra.mxu2 %v387_v10  ;;  %v377_v9 = vld [vmem:[%s2557_s13 + $0x18] sm:$0xff] }
 0x166   : > { %1997 = vpow2.f32 %v895_v18  ;;  %v2575_v18 = vpop.f32.mrf.mxu0  ;;  %v397_v10 = vld [vmem:[%s2557_s13 + $0xb8] sm:$0xff] }
 0x167   : > { %1999 = vpow2.f32 %v863_v20  ;;  %1563 = vmatpush.msra.mxu3 %v404_v12  ;;  %v376_v12 = vld [vmem:[%s2557_s13 + $0x10] sm:$0xff] }
 0x168   : > { %v770_v19 = vpop.xlane.xlu2 %769 }
 0x169   : > { %v802_v21 = vpop.xlane.xlu0 %801  ;;  %v829_v24 = vsub.f32 %v2434_v32, %v770_v19  ;;  %v2531_v43 = vpop.f32.mrf.mxu1  ;;  %v386_v19 = vld [vmem:[%s2557_s13 + $0x60] sm:$0xff] }
 0x16a   : > { %v845_v25 = vsub.f32 %v2436_v33, %v802_v21  ;;  %v385_v21 = vld [vmem:[%s2557_s13 + $0x58] sm:$0xff]  ;;  %1500 = vmatpush.msra.mxu2 %v386_v19  ;;  %v374_v19 = vld [vmem:[%s2557_s13] sm:$0xff] }
 0x16b   : > { %v2511_v23 = vpop.eup %1995  ;;  %v865_v26 = vmul.f32 1.442695, %v829_v24 }
 0x16c   : > { %815 = vmax.xlane.f32.xlu0 %v2507_v17  ;;  %925 = vadd.xlane.f32.xlu1 %v2509_v22  ;;  %v897_v29 = vmul.f32 1.442695, %v845_v25  ;;  %v2520_v30 = vpop.eup %1997  ;;  %v384_v25 = vld [vmem:[%s2557_s13 + $0x50] sm:$0xff] }
 0x16d   : > { %957 = vadd.xlane.f32.xlu2 %v2511_v23  ;;  %v2522_v34 = vpop.eup %1999  ;;  %2001 = vpow2.f32 %v865_v26  ;;  %1501 = vmatpush.msra.mxu2 %v385_v21  ;;  %v393_v21 = vld [vmem:[%s2557_s13 + $0x98] sm:$0xff] }
 0x16e   : > { %2003 = vpow2.f32 %v897_v29 }
 0x16f   : > { %1502 = vmatpush.msra.mxu2 %v384_v25  ;;  %v391_v25 = vld [vmem:[%s2557_s13 + $0x88] sm:$0xff] }
 0x170   : > { %v772_v27 = vpop.xlane.xlu1 %771 }
 0x171   : > { %v804_v31 = vpop.xlane.xlu2 %803  ;;  %v830_v32 = vsub.f32 %v2442_v36, %v772_v27  ;;  %v2586_v26 = vpop.f32.mrf.mxu1 }
 0x172   : > { %v846_v33 = vsub.f32 %v2444_v37, %v804_v31 }
 0x173   : > { %v867_v38 = vmul.f32 1.442695, %v830_v32  ;;  %v2529_v39 = vpop.eup %2001 }
 0x174   : > { %959 = vadd.xlane.f32.xlu0 %v2520_v30  ;;  %817 = vmax.xlane.f32.xlu1 %v2518_v28  ;;  %v899_v42 = vmul.f32 1.442695, %v846_v33  ;;  %v2533_v44 = vpop.eup %2003 }
 0x175   : > { %927 = vadd.xlane.f32.xlu2 %v2522_v34  ;;  %2005 = vpow2.f32 %v867_v38 }
 0x176   : > { %2007 = vpow2.f32 %v899_v42 }
 0x178   : > { %v774_v45 = vpop.xlane.xlu0 %773 }
 0x179   : > { %v806_v35 = vpop.xlane.xlu1 %805  ;;  %v831_v37 = vsub.f32 %v2450_v40, %v774_v45 }
 0x17a   : > { %v847_v36 = vsub.f32 %v2452_v41, %v806_v35 }
 0x17b   : > { %v869_v57 = vmul.f32 1.442695, %v831_v37  ;;  %v2542_v59 = vpop.eup %2005  ;;  %v2600_v37 = vpop.f32.mrf.mxu1 }
 0x17c   : > { %929 = vadd.xlane.f32.xlu0 %v2529_v39  ;;  %961 = vadd.xlane.f32.xlu1 %v2533_v44  ;;  %v901_v56 = vmul.f32 1.442695, %v847_v36  ;;  %v2544_v61 = vpop.eup %2007  ;;  %v2598_v36 = vpop.f32.mrf.mxu0 }
 0x17d   : > { %819 = vmax.xlane.f32.xlu2 %v2531_v43 }
 0x17e   : > { %2009 = vpow2.f32 %v901_v56 }
 0x17f   : > { %2011 = vpow2.f32 %v869_v57 }
 0x181   : > { %v808_v55 = vpop.xlane.xlu2 %807  ;;  %v776_v58 = vpop.xlane.xlu1 %775 }
 0x182   : > { %v848_v62 = vsub.f32 %v2462_v47, %v808_v55  ;;  %v832_v40 = vsub.f32 %v2460_v46, %v776_v58  ;;  %v382_v58 = vld [vmem:[%s2557_s13 + $0x40] sm:$0xff] }
 0x184   : > { %931 = vadd.xlane.f32.xlu1 %v2542_v59  ;;  %785 = vmax.xlane.f32.xlu0 %v2540_v54  ;;  %v903_v41 = vmul.f32 1.442695, %v848_v62  ;;  %v871_v0 = vmul.f32 1.442695, %v832_v40  ;;  %v2559_v46 = vpop.eup %2009  ;;  %v402_v62 = vld [vmem:[%s2557_s13 + $0xe0] sm:$0xff] }
 0x185   : > { %963 = vadd.xlane.f32.xlu2 %v2544_v61  ;;  %v2561_v47 = vpop.eup %2011 }
 0x186   : > { %2013 = vpow2.f32 %v903_v41  ;;  %v381_v41 = vld [vmem:[%s2557_s13 + $0x38] sm:$0xff] }
 0x187   : > { %2015 = vpow2.f32 %v871_v0  ;;  %v401_v0 = vld [vmem:[%s2557_s13 + $0xd8] sm:$0xff] }
 0x189   : > { %v810_v1 = vpop.xlane.xlu0 %809  ;;  %v778_v2 = vpop.xlane.xlu2 %777 }
 0x18a   : > { %v833_v5 = vsub.f32 %v2466_v48, %v778_v2  ;;  %v849_v8 = vsub.f32 %v2468_v49, %v810_v1  ;;  %v380_v1 = vld [vmem:[%s2557_s13 + $0x30] sm:$0xff] }
 0x18b   : > { %v400_v2 = vld [vmem:[%s2557_s13 + $0xd0] sm:$0xff] }
 0x18c   : > { %965 = vadd.xlane.f32.xlu0 %v2559_v46  ;;  %787 = vmax.xlane.f32.xlu1 %v2551_v63  ;;  %v873_v15 = vmul.f32 1.442695, %v833_v5  ;;  %v2573_v16 = vpop.eup %2013  ;;  %v905_v48 = vmul.f32 1.442695, %v849_v8  ;;  %v379_v5 = vld [vmem:[%s2557_s13 + $0x28] sm:$0xff]  ;;  %v398_v8 = vld [vmem:[%s2557_s13 + $0xc0] sm:$0xff] }
 0x18d   : > { %933 = vadd.xlane.f32.xlu2 %v2561_v47  ;;  %v2578_v20 = vpop.eup %2015 }
 0x18e   : > { %2017 = vpow2.f32 %v873_v15  ;;  %v375_v15 = vld [vmem:[%s2557_s13 + $0x8] sm:$0xff] }
 0x18f   : > { %2019 = vpow2.f32 %v905_v48  ;;  %v395_v48 = vld [vmem:[%s2557_s13 + $0xa8] sm:$0xff] }
 0x191   : > { %v812_v14 = vpop.xlane.xlu1 %811  ;;  %v780_v49 = vpop.xlane.xlu0 %779 }
 0x192   : > { %v834_v24 = vsub.f32 %v2472_v50, %v780_v49  ;;  %v850_v35 = vsub.f32 %v2474_v51, %v812_v14  ;;  %v396_v14 = vld [vmem:[%s2557_s13 + $0xb0] sm:$0xff]  ;;  %v394_v49 = vld [vmem:[%s2557_s13 + $0xa0] sm:$0xff] }
 0x194   : > { %935 = vadd.xlane.f32.xlu0 %v2578_v20  ;;  %967 = vadd.xlane.f32.xlu1 %v2573_v16  ;;  %v875_v27 = vmul.f32 1.442695, %v834_v24  ;;  %v2588_v31 = vpop.eup %2017  ;;  %v907_v42 = vmul.f32 1.442695, %v850_v35  ;;  %v392_v24 = vld [vmem:[%s2557_s13 + $0x90] sm:$0xff] }
 0x195   : > { %789 = vmax.xlane.f32.xlu2 %v2575_v18  ;;  %v2590_v33 = vpop.eup %2019 }
 0x196   : > { %2021 = vpow2.f32 %v875_v27  ;;  %v390_v27 = vld [vmem:[%s2557_s13 + $0x80] sm:$0xff] }
 0x197   : > { %2023 = vpow2.f32 %v907_v42 }
 0x199   : > { %v782_v29 = vpop.xlane.xlu1 %781  ;;  %v814_v32 = vpop.xlane.xlu2 %813 }
 0x19a   : > { %v835_v50 = vsub.f32 %v2478_v52, %v782_v29  ;;  %v851_v38 = vsub.f32 %v2480_v53, %v814_v32  ;;  %v383_v52 = vld [vmem:[%s2557_s13 + $0x48] sm:$0xff] }
 0x19b   : > { %v403_v53 = vld [vmem:[%s2557_s13 + $0xe8] sm:$0xff]  ;;  %1503 = vmatpush.msra.mxu2 %v383_v52 }
 0x19c   : > { %821 = vmax.xlane.f32.xlu0 %v2586_v26  ;;  %937 = vadd.xlane.f32.xlu1 %v2588_v31  ;;  %v877_v45 = vmul.f32 1.442695, %v835_v50  ;;  %v909_v51 = vmul.f32 1.442695, %v851_v38  ;;  %v2602_v55 = vpop.eup %2021 }
 0x19d   : > { %969 = vadd.xlane.f32.xlu2 %v2590_v33  ;;  %v2609_v56 = vpop.eup %2023  ;;  %1564 = vmatpush.msra.mxu3 %v403_v53 }
 0x19e   : > { %2025 = vpow2.f32 %v877_v45  ;;  %1504 = vmatpush.msra.mxu2 %v382_v58 }
 0x19f   : > { %2027 = vpow2.f32 %v909_v51  ;;  %1565 = vmatpush.msra.mxu3 %v402_v62 }
 0x1a0   : > { %1505 = vmatpush.msra.mxu2 %v381_v41 }
 0x1a1   : > { %1566 = vmatpush.msra.mxu3 %v401_v0 }
 0x1a2   : > { %1506 = vmatpush.msra.mxu2 %v380_v1 }
 0x1a3   : > { %1567 = vmatpush.msra.mxu3 %v400_v2 }
 0x1a4   : > { %823 = vmax.xlane.f32.xlu1 %v2600_v37  ;;  %791 = vmax.xlane.f32.xlu0 %v2598_v36  ;;  %v2611_v57 = vpop.eup %2025 }
 0x1a5   : > { %939 = vadd.xlane.f32.xlu2 %v2602_v55  ;;  %v2615_v40 = vpop.eup %2027  ;;  %1507 = vmatpush.msra.mxu2 %v379_v5 }
 0x1a6   : > { %1568 = vmatpush.msra.mxu3 %v399_v6 }
 0x1a7   : > { %1508 = vmatpush.msra.mxu2 %v378_v7 }
 0x1a8   : > { %1569 = vmatpush.msra.mxu3 %v398_v8 }
 0x1a9   : > { %1509 = vmatpush.msra.mxu2 %v377_v9 }
 0x1aa   : > { %1570 = vmatpush.msra.mxu3 %v397_v10 }
 0x1ab   : > { %1510 = vmatpush.msra.mxu2 %v376_v12 }
 0x1ac   : > { %941 = vadd.xlane.f32.xlu1 %v2611_v57  ;;  %971 = vadd.xlane.f32.xlu0 %v2609_v56 }
 0x1ad   : > { %973 = vadd.xlane.f32.xlu2 %v2615_v40  ;;  %1571 = vmatpush.msra.mxu3 %v396_v14 }
 0x1ae   : > { %1511 = vmatpush.msra.mxu2 %v375_v15 }
 0x1af   : > { %1572 = vmatpush.msra.mxu3 %v395_v48 }
 0x1b0   : > { %1512 = vmatpush.msra.mxu2 %v374_v19 }
 0x1b1   : > { %1573 = vmatpush.msra.mxu3 %v394_v49 }
 0x1b3   : > { %1574 = vmatpush.msra.mxu3 %v393_v21 }
 0x1b5   : > { %1575 = vmatpush.msra.mxu3 %v392_v24 }
 0x1b7   : > { %1576 = vmatpush.msra.mxu3 %v391_v25 }
 0x1b9   : > { %1577 = vmatpush.msra.mxu3 %v390_v27 }
 0x1c7   : > { %v922_v29 = vpop.xlane.xlu2 %921 }
 0x1c8   : > { %2029 = vrcp.f32 %v922_v29  ;;  %v996_v52 = vand.u32 2147483648, %v922_v29  ;;  %v994_v58 = vand.u32 2147483647, %v922_v29  ;;  %vm990_vm2 = vweird.f32 %v922_v29 }
 0x1ca   : > { %v997_v0 = vor.u32 1.1754944e-38, %v996_v52  ;;  %vm995_vm4 = vcmp.eq.f32.partialorder %v994_v58, 8.507059e+37 }
 0x1ce   : > { %v2030_v32 = vpop.eup %2029 }
 0x1cf   : > { %v986_v35 = vmul.f32 %v2030_v32, %v922_v29  ;;  %v954_v50 = vpop.xlane.xlu0 %953  ;;  %v784_v38 = vpop.xlane.xlu2 %783  ;;  %vm991_vm1 = vweird.f32 %v2030_v32 }
 0x1d0   : > { %2031 = vrcp.f32 %v954_v50  ;;  %v836_v42 = vsub.f32 %v2491_v3, %v784_v38  ;;  %vm992_vm3 = vmor %vm990_vm2, %vm991_vm1  ;;  %v1220_v10 = vand.u32 2147483648, %v954_v50  ;;  %v1218_v14 = vand.u32 2147483647, %v954_v50 }
 0x1d1   : > { %v987_v45 = vsub.f32 1.0, %v986_v35  ;;  %vm1214_vm6 = vweird.f32 %v954_v50 }
 0x1d2   : > { %v879_v51 = vmul.f32 1.442695, %v836_v42  ;;  %v1221_v19 = vor.u32 1.1754944e-38, %v1220_v10  ;;  %vm1219_vm8 = vcmp.eq.f32.partialorder %v1218_v14, 8.507059e+37 }
 0x1d3   : > { %v988_v53 = vmul.f32 %v2030_v32, %v987_v45 }
 0x1d4   : > { %2033 = vpow2.f32 %v879_v51 }
 0x1d5   : > { %v989_v62 = vadd.f32 %v2030_v32, %v988_v53 }
 0x1d6   : > { %v2032_v41 = vpop.eup %2031 }
 0x1d7   : > { %v1210_v1 = vmul.f32 %v2032_v41, %v954_v50  ;;  %v924_v2 = vpop.xlane.xlu0 %923  ;;  %v2644_v5 = vpop.xlane.xlu1 %955  ;;  %v993_v3 = vsel %vm992_vm3, %v2030_v32, %v989_v62  ;;  %vm1215_vm5 = vweird.f32 %v2032_v41 }
 0x1d8   : > { %2035 = vrcp.f32 %v924_v2  ;;  %v998_v6 = vsel %vm995_vm4, %v997_v0, %v993_v3  ;;  %vm1216_vm7 = vmor %vm1214_vm6, %vm1215_vm5  ;;  %v1008_v27 = vand.u32 2147483647, %v924_v2  ;;  %v1010_v45 = vand.u32 2147483648, %v924_v2 }
 0x1d9   : > { %v1211_v7 = vsub.f32 1.0, %v1210_v1  ;;  %2037 = vrcp.f32 %v2644_v5  ;;  %v1433_v8 = vmul.f32 %v2486_v60, %v998_v6  ;;  %v1232_v53 = vand.u32 2147483647, %v2644_v5 }
 0x1da   : > { %v2648_v9 = vpop.eup %2033  ;;  %v1234_v58 = vand.u32 2147483648, %v2644_v5  ;;  %vm1004_vm10 = vweird.f32 %v924_v2  ;;  %vm2666_vm11 = vcmp.eq.f32.partialorder %v1008_v27, 8.507059e+37  ;;  %vm1228_vm12 = vweird.f32 %v2644_v5 }
 0x1db   : > { %v1212_v12 = vmul.f32 %v2032_v41, %v1211_v7  ;;  %1465 = vst [vmem:[%s2650_s22] sm:$0xff] %v1433_v8  ;;  %1513 = vmatmul.f32.vlgmr.msra.gmra.mxu2 %v1433_v8  ;;  %943 = vadd.xlane.f32.xlu0 %v2648_v9  ;;  %vm2675_vm15 = vcmp.eq.f32.partialorder %v1232_v53, 8.507059e+37 }
 0x1dd   : > { %v1213_v15 = vadd.f32 %v2032_v41, %v1212_v12 }
 0x1de   : > { %v2036_v48 = vpop.eup %2035 }
 0x1df   : > { %v2038_v49 = vpop.eup %2037  ;;  %v1000_v60 = vmul.f32 %v2036_v48, %v924_v2  ;;  %v816_v21 = vpop.xlane.xlu0 %815  ;;  %v1217_v25 = vsel %vm1216_vm7, %v2032_v41, %v1213_v15  ;;  %vm1005_vm9 = vweird.f32 %v2036_v48  ;;  %v1235_v2 = vor.u32 1.1754944e-38, %v1234_v58 }
 0x1e0   : > { %v2654_v24 = vpop.xlane.xlu1 %925  ;;  %v1224_v29 = vmul.f32 %v2038_v49, %v2644_v5  ;;  %v852_v32 = vsub.f32 %v2507_v17, %v816_v21  ;;  %v2659_v35 = vpop.xlane.xlu2 %957  ;;  %v1222_v50 = vsel %vm1219_vm8, %v1221_v19, %v1217_v25  ;;  %vm1229_vm13 = vweird.f32 %v2038_v49  ;;  %vm2671_vm14 = vmor %vm1004_vm10, %vm1005_vm9 }
 0x1e1   : > { %2039 = vrcp.f32 %v2654_v24  ;;  %v1001_v38 = vsub.f32 1.0, %v1000_v60  ;;  %v1449_v42 = vmul.f32 %v2493_v4, %v1222_v50  ;;  %v1011_v4 = vor.u32 1.1754944e-38, %v1010_v45  ;;  %vm1230_vm1 = vmor %vm1228_vm12, %vm1229_vm13 }
 0x1e2   : > { %2041 = vrcp.f32 %v2659_v35  ;;  %v1225_v51 = vsub.f32 1.0, %v1224_v29  ;;  %v911_v52 = vmul.f32 1.442695, %v852_v32  ;;  %v1022_v8 = vand.u32 2147483647, %v2654_v24 }
 0x1e3   : > { %v1002_v62 = vmul.f32 %v2036_v48, %v1001_v38  ;;  %1481 = vst [vmem:[%s2650_s22 + $0x80] sm:$0xff] %v1449_v42  ;;  %1578 = vmatmul.f32.vlgmr.msra.gmra.mxu3 %v1449_v42  ;;  %v1024_v60 = vand.u32 2147483648, %v2654_v24  ;;  %v1246_v21 = vand.u32 2147483647, %v2659_v35  ;;  %vm1018_vm4 = vweird.f32 %v2654_v24 }
 0x1e4   : > { %v1226_v17 = vmul.f32 %v2038_v49, %v1225_v51  ;;  %2043 = vpow2.f32 %v911_v52  ;;  %v1248_v52 = vand.u32 2147483648, %v2659_v35  ;;  %vm2714_vm5 = vcmp.eq.f32.partialorder %v1022_v8, 8.507059e+37 }
 0x1e5   : > { %v1003_v0 = vadd.f32 %v2036_v48, %v1002_v62  ;;  %vm1242_vm6 = vweird.f32 %v2659_v35  ;;  %vm2726_vm8 = vcmp.eq.f32.partialorder %v1246_v21, 8.507059e+37 }
 0x1e6   : > { %v1227_v6 = vadd.f32 %v2038_v49, %v1226_v17  ;;  %v1025_v17 = vor.u32 1.1754944e-38, %v1024_v60 }
 0x1e7   : > { %v2040_v1 = vpop.eup %2039  ;;  %v2683_v14 = vpop.xlane.xlu0 %959  ;;  %v1007_v19 = vsel %vm2671_vm14, %v2036_v48, %v1003_v0 }
 0x1e8   : > { %v2680_v10 = vpop.eup %2041  ;;  %v1014_v12 = vmul.f32 %v2040_v1, %v2654_v24  ;;  %v818_v15 = vpop.xlane.xlu1 %817  ;;  %2045 = vrcp.f32 %v2683_v14  ;;  %v1012_v32 = vsel %vm2666_vm11, %v1011_v4, %v1007_v19  ;;  %v1231_v38 = vsel %vm1230_vm1, %v2038_v49, %v1227_v6 }
 0x1e9   : > { %v1238_v25 = vmul.f32 %v2680_v10, %v2659_v35  ;;  %v853_v27 = vsub.f32 %v2518_v28, %v818_v15  ;;  %v2693_v29 = vpop.xlane.xlu2 %927  ;;  %v1434_v50 = vmul.f32 %v2499_v11, %v1012_v32  ;;  %v1236_v51 = vsel %vm2675_vm15, %v1235_v2, %v1231_v38 }
 0x1ea   : > { %v1015_v48 = vsub.f32 1.0, %v1014_v12  ;;  %2047 = vrcp.f32 %v2693_v29  ;;  %v2702_v42 = vpop.eup %2043  ;;  %v1450_v5 = vmul.f32 %v2501_v13, %v1236_v51  ;;  %vm1019_vm2 = vweird.f32 %v2040_v1 }
 0x1eb   : > { %v1239_v45 = vsub.f32 1.0, %v1238_v25  ;;  %v913_v28 = vmul.f32 1.442695, %v853_v27  ;;  %1466 = vst [vmem:[%s2650_s22 + $0x8] sm:$0xff] %v1434_v50  ;;  %1516 = vmatmul.f32.gmra.mxu2 %v1434_v50  ;;  %975 = vadd.xlane.f32.xlu1 %v2702_v42  ;;  %vm1243_vm3 = vweird.f32 %v2680_v10  ;;  %vm2721_vm7 = vmor %vm1018_vm4, %vm1019_vm2  ;;  %v1249_v24 = vor.u32 1.1754944e-38, %v1248_v52 }
 0x1ec   : > { %v1016_v53 = vmul.f32 %v2040_v1, %v1015_v48  ;;  %1482 = vst [vmem:[%s2650_s22 + $0x88] sm:$0xff] %v1450_v5  ;;  %1581 = vmatmul.f32.gmra.mxu3 %v1450_v5  ;;  %vm1244_vm9 = vmor %vm1242_vm6, %vm1243_vm3  ;;  %v1036_v2 = vand.u32 2147483647, %v2693_v29  ;;  %v1038_v8 = vand.u32 2147483648, %v2693_v29  ;;  %v1260_v25 = vand.u32 2147483647, %v2683_v14 }
 0x1ed   : > { %v1240_v11 = vmul.f32 %v2680_v10, %v1239_v45  ;;  %2049 = vpow2.f32 %v913_v28  ;;  %v1262_v50 = vand.u32 2147483648, %v2683_v14  ;;  %vm1032_vm10 = vweird.f32 %v2693_v29 }
 0x1ee   : > { %v1017_v49 = vadd.f32 %v2040_v1, %v1016_v53  ;;  %v2719_v13 = vpop.eup %2045  ;;  %vm2761_vm13 = vcmp.eq.f32.partialorder %v1036_v2, 8.507059e+37  ;;  %vm1256_vm14 = vweird.f32 %v2683_v14  ;;  %v1039_v51 = vor.u32 1.1754944e-38, %v1038_v8 }
 0x1ef   : > { %v1241_v41 = vadd.f32 %v2680_v10, %v1240_v11  ;;  %v1252_v3 = vmul.f32 %v2719_v13, %v2683_v14  ;;  %v2732_v6 = vpop.xlane.xlu0 %929  ;;  %vm1257_vm11 = vweird.f32 %v2719_v13  ;;  %vm2769_vm15 = vcmp.eq.f32.partialorder %v1260_v25, 8.507059e+37 }
 0x1f0   : > { %v2048_v4 = vpop.eup %2047  ;;  %v2734_v35 = vpop.xlane.xlu1 %961  ;;  %v1021_v7 = vsel %vm2721_vm7, %v2040_v1, %v1017_v49  ;;  %2051 = vrcp.f32 %v2732_v6  ;;  %vm2773_vm1 = vmor %vm1256_vm14, %vm1257_vm11  ;;  %v1263_v49 = vor.u32 1.1754944e-38, %v1262_v50  ;;  %v1050_v14 = vand.u32 2147483647, %v2732_v6 }
 0x1f1   : > { %v1028_v12 = vmul.f32 %v2048_v4, %v2693_v29  ;;  %v820_v15 = vpop.xlane.xlu2 %819  ;;  %v1026_v19 = vsel %vm2714_vm5, %v1025_v17, %v1021_v7  ;;  %v1245_v60 = vsel %vm1244_vm9, %v2680_v10, %v1241_v41  ;;  %v1253_v21 = vsub.f32 1.0, %v1252_v3 }
 0x1f2   : > { %2053 = vrcp.f32 %v2734_v35  ;;  %v1435_v1 = vmul.f32 %v2509_v22, %v1026_v19  ;;  %v1250_v48 = vsel %vm2726_vm8, %v1249_v24, %v1245_v60  ;;  %vm1033_vm12 = vweird.f32 %v2048_v4 }
 0x1f3   : > { %v2750_v27 = vpop.eup %2049  ;;  %v1029_v32 = vsub.f32 1.0, %v1028_v12  ;;  %v1254_v38 = vmul.f32 %v2719_v13, %v1253_v21  ;;  %v1451_v10 = vmul.f32 %v2511_v23, %v1250_v48  ;;  %v854_v28 = vsub.f32 %v2531_v43, %v820_v15  ;;  %vm1034_vm2 = vmor %vm1032_vm10, %vm1033_vm12 }
 0x1f4   : > { %1467 = vst [vmem:[%s2650_s22 + $0x10] sm:$0xff] %v1435_v1  ;;  %1519 = vmatmul.f32.gmra.mxu2 %v1435_v1  ;;  %977 = vadd.xlane.f32.xlu0 %v2750_v27  ;;  %v1052_v43 = vand.u32 2147483648, %v2732_v6  ;;  %v1274_v24 = vand.u32 2147483647, %v2734_v35  ;;  %v1276_v3 = vand.u32 2147483648, %v2734_v35  ;;  %vm1046_vm4 = vweird.f32 %v2732_v6 }
 0x1f5   : > { %v1030_v22 = vmul.f32 %v2048_v4, %v1029_v32  ;;  %1483 = vst [vmem:[%s2650_s22 + $0x90] sm:$0xff] %v1451_v10  ;;  %1584 = vmatmul.f32.gmra.mxu3 %v1451_v10  ;;  %v1255_v23 = vadd.f32 %v2719_v13, %v1254_v38  ;;  %v915_v32 = vmul.f32 1.442695, %v854_v28  ;;  %vm1270_vm5 = vweird.f32 %v2734_v35 }
 0x1f6   : > { %v2052_v53 = vpop.eup %2051  ;;  %vm2810_vm6 = vcmp.eq.f32.partialorder %v1050_v14, 8.507059e+37  ;;  %vm2822_vm9 = vcmp.eq.f32.partialorder %v1274_v24, 8.507059e+37  ;;  %v1277_v10 = vor.u32 1.1754944e-38, %v1276_v3 }
 0x1f7   : > { %v1031_v5 = vadd.f32 %v2048_v4, %v1030_v22  ;;  %v1042_v62 = vmul.f32 %v2052_v53, %v2732_v6  ;;  %v786_v41 = vpop.xlane.xlu0 %785  ;;  %v1259_v0 = vsel %vm2773_vm1, %v2719_v13, %v1255_v23  ;;  %vm1047_vm3 = vweird.f32 %v2052_v53 }
 0x1f8   : > { %v2779_v58 = vpop.eup %2053  ;;  %v2782_v17 = vpop.xlane.xlu1 %931  ;;  %v837_v8 = vsub.f32 %v2540_v54, %v786_v41  ;;  %v1264_v15 = vsel %vm2769_vm15, %v1263_v49, %v1259_v0  ;;  %vm2817_vm8 = vmor %vm1046_vm4, %vm1047_vm3 }
 0x1f9   : > { %v1266_v7 = vmul.f32 %v2779_v58, %v2734_v35  ;;  %2055 = vrcp.f32 %v2782_v17  ;;  %v2795_v2 = vpop.xlane.xlu2 %963  ;;  %v1035_v29 = vsel %vm1034_vm2, %v2048_v4, %v1031_v5  ;;  %v1043_v12 = vsub.f32 1.0, %v1042_v62 }
 0x1fa   : > { %2057 = vrcp.f32 %v2795_v2  ;;  %v1040_v13 = vsel %vm2761_vm13, %v1039_v51, %v1035_v29  ;;  %v881_v60 = vmul.f32 1.442695, %v837_v8  ;;  %v1452_v1 = vmul.f32 %v2520_v30, %v1264_v15 }
 0x1fb   : > { %v1267_v19 = vsub.f32 1.0, %v1266_v7  ;;  %v1436_v21 = vmul.f32 %v2522_v34, %v1040_v13  ;;  %v1044_v25 = vmul.f32 %v2052_v53, %v1043_v12  ;;  %v1053_v30 = vor.u32 1.1754944e-38, %v1052_v43 }
 0x1fc   : > { %2059 = vpow2.f32 %v881_v60  ;;  %1484 = vst [vmem:[%s2650_s22 + $0x98] sm:$0xff] %v1452_v1  ;;  %vm1271_vm7 = vweird.f32 %v2779_v58  ;;  %v1064_v22 = vand.u32 2147483647, %v2782_v17  ;;  %v1066_v5 = vand.u32 2147483648, %v2782_v17 }
 0x1fd   : > { %v1268_v54 = vmul.f32 %v2779_v58, %v1267_v19  ;;  %1468 = vst [vmem:[%s2650_s22 + $0x18] sm:$0xff] %v1436_v21  ;;  %1522 = vmatmul.f32.gmra.mxu2 %v1436_v21  ;;  %1587 = vmatmul.f32.gmra.mxu3 %v1452_v1  ;;  %v1045_v4 = vadd.f32 %v2052_v53, %v1044_v25  ;;  %v1288_v11 = vand.u32 2147483647, %v2795_v2  ;;  %vm1272_vm10 = vmor %vm1270_vm5, %vm1271_vm7  ;;  %v1290_v8 = vand.u32 2147483648, %v2795_v2 }
 0x1fe   : > { %vm1060_vm12 = vweird.f32 %v2782_v17  ;;  %vm2867_vm14 = vcmp.eq.f32.partialorder %v1064_v22, 8.507059e+37  ;;  %vm1284_vm15 = vweird.f32 %v2795_v2 }
 0x1ff   : > { %v2815_v34 = vpop.eup %2055  ;;  %v1269_v6 = vadd.f32 %v2779_v58, %v1268_v54  ;;  %v2831_v51 = vpop.xlane.xlu0 %965  ;;  %v1049_v52 = vsel %vm2817_vm8, %v2052_v53, %v1045_v4  ;;  %vm2879_vm2 = vcmp.eq.f32.partialorder %v1288_v11, 8.507059e+37  ;;  %v1291_v60 = vor.u32 1.1754944e-38, %v1290_v8 }
 0x200   : > { %v2827_v45 = vpop.eup %2057  ;;  %v1056_v28 = vmul.f32 %v2815_v34, %v2782_v17  ;;  %v788_v23 = vpop.xlane.xlu1 %787  ;;  %2061 = vrcp.f32 %v2831_v51  ;;  %v1054_v62 = vsel %vm2810_vm6, %v1053_v30, %v1049_v52  ;;  %vm1061_vm11 = vweird.f32 %v2815_v34 }
 0x201   : > { %v1280_v49 = vmul.f32 %v2827_v45, %v2795_v2  ;;  %v2839_v14 = vpop.xlane.xlu2 %933  ;;  %v838_v43 = vsub.f32 %v2551_v63, %v788_v23  ;;  %v1437_v41 = vmul.f32 %v2529_v39, %v1054_v62  ;;  %v1273_v0 = vsel %vm1272_vm10, %v2779_v58, %v1269_v6  ;;  %vm2874_vm1 = vmor %vm1060_vm12, %vm1061_vm11 }
 0x202   : > { %v1057_v53 = vsub.f32 1.0, %v1056_v28  ;;  %2063 = vrcp.f32 %v2839_v14  ;;  %v2852_v24 = vpop.eup %2059  ;;  %v1278_v7 = vsel %vm2822_vm9, %v1277_v10, %v1273_v0  ;;  %vm1285_vm13 = vweird.f32 %v2827_v45 }
 0x203   : > { %v1281_v3 = vsub.f32 1.0, %v1280_v49  ;;  %v883_v63 = vmul.f32 1.442695, %v838_v43  ;;  %2065 = vpow2.f32 %v915_v32  ;;  %1469 = vst [vmem:[%s2650_s22 + $0x20] sm:$0xff] %v1437_v41  ;;  %v1453_v29 = vmul.f32 %v2533_v44, %v1278_v7  ;;  %945 = vadd.xlane.f32.xlu2 %v2852_v24  ;;  %vm2897_vm3 = vmor %vm1284_vm15, %vm1285_vm13 }
 0x204   : > { %v1058_v35 = vmul.f32 %v2815_v34, %v1057_v53  ;;  %v1067_v44 = vor.u32 1.1754944e-38, %v1066_v5  ;;  %v1078_v21 = vand.u32 2147483647, %v2839_v14  ;;  %v1080_v48 = vand.u32 2147483648, %v2839_v14 }
 0x205   : > { %v1282_v39 = vmul.f32 %v2827_v45, %v1281_v3  ;;  %2067 = vpow2.f32 %v883_v63  ;;  %1525 = vmatmul.f32.gmra.mxu2 %v1437_v41  ;;  %1485 = vst [vmem:[%s2650_s22 + $0xa0] sm:$0xff] %v1453_v29  ;;  %1590 = vmatmul.f32.gmra.mxu3 %v1453_v29  ;;  %v1302_v30 = vand.u32 2147483647, %v2831_v51  ;;  %vm1074_vm4 = vweird.f32 %v2839_v14 }
 0x206   : > { %v1059_v58 = vadd.f32 %v2815_v34, %v1058_v35  ;;  %v2872_v13 = vpop.eup %2061  ;;  %vm2930_vm7 = vcmp.eq.f32.partialorder %v1078_v21, 8.507059e+37  ;;  %vm1298_vm8 = vweird.f32 %v2831_v51 }
 0x207   : > { %v1283_v17 = vadd.f32 %v2827_v45, %v1282_v39  ;;  %v1294_v2 = vmul.f32 %v2872_v13, %v2831_v51  ;;  %v2888_v25 = vpop.xlane.xlu0 %935  ;;  %vm1299_vm5 = vweird.f32 %v2872_v13  ;;  %vm2937_vm9 = vcmp.eq.f32.partialorder %v1302_v30, 8.507059e+37 }
 0x208   : > { %v2884_v1 = vpop.eup %2063  ;;  %v2890_v32 = vpop.xlane.xlu1 %967  ;;  %v1063_v54 = vsel %vm2874_vm1, %v2815_v34, %v1059_v58  ;;  %2069 = vrcp.f32 %v2888_v25  ;;  %vm2942_vm10 = vmor %vm1298_vm8, %vm1299_vm5  ;;  %v1094_v8 = vand.u32 2147483648, %v2888_v25  ;;  %vm1088_vm13 = vweird.f32 %v2888_v25 }
 0x209   : > { %v1070_v50 = vmul.f32 %v2884_v1, %v2839_v14  ;;  %v790_v6 = vpop.xlane.xlu2 %789  ;;  %v1068_v34 = vsel %vm2867_vm14, %v1067_v44, %v1063_v54  ;;  %v1287_v38 = vsel %vm2897_vm3, %v2827_v45, %v1283_v17  ;;  %v2911_v10 = vpop.eup %2065  ;;  %v1295_v22 = vsub.f32 1.0, %v1294_v2 }
 0x20a   : > { %2071 = vrcp.f32 %v2890_v32  ;;  %v839_v28 = vsub.f32 %v2575_v18, %v790_v6  ;;  %v1438_v23 = vmul.f32 %v2542_v59, %v1068_v34  ;;  %v1292_v11 = vsel %vm2879_vm2, %v1291_v60, %v1287_v38 }
 0x20b   : > { %v2916_v52 = vpop.eup %2067  ;;  %v1071_v5 = vsub.f32 1.0, %v1070_v50  ;;  %v1304_v45 = vand.u32 2147483648, %v2831_v51  ;;  %v1296_v49 = vmul.f32 %v2872_v13, %v1295_v22  ;;  %v1454_v62 = vmul.f32 %v2544_v61, %v1292_v11  ;;  %979 = vadd.xlane.f32.xlu2 %v2911_v10 }
 0x20c   : > { %v885_v43 = vmul.f32 1.442695, %v839_v28  ;;  %1470 = vst [vmem:[%s2650_s22 + $0x28] sm:$0xff] %v1438_v23  ;;  %947 = vadd.xlane.f32.xlu1 %v2916_v52  ;;  %vm1075_vm6 = vweird.f32 %v2884_v1  ;;  %v1081_v61 = vor.u32 1.1754944e-38, %v1080_v48  ;;  %v1092_v51 = vand.u32 2147483647, %v2888_v25 }
 0x20d   : > { %v1072_v59 = vmul.f32 %v2884_v1, %v1071_v5  ;;  %1528 = vmatmul.f32.gmra.mxu2 %v1438_v23  ;;  %1486 = vst [vmem:[%s2650_s22 + $0xa8] sm:$0xff] %v1454_v62  ;;  %1593 = vmatmul.f32.gmra.mxu3 %v1454_v62  ;;  %v1297_v53 = vadd.f32 %v2872_v13, %v1296_v49  ;;  %v1305_v7 = vor.u32 1.1754944e-38, %v1304_v45  ;;  %vm1076_vm11 = vmor %vm1074_vm4, %vm1075_vm6  ;;  %v1316_v44 = vand.u32 2147483647, %v2890_v32 }
 0x20e   : > { %2073 = vpow2.f32 %v885_v43  ;;  %v2070_v0 = vpop.eup %2069  ;;  %v1318_v15 = vand.u32 2147483648, %v2890_v32  ;;  %vm1312_vm14 = vweird.f32 %v2890_v32  ;;  %vm2984_vm15 = vcmp.eq.f32.partialorder %v1092_v51, 8.507059e+37 }
 0x20f   : > { %v1073_v3 = vadd.f32 %v2884_v1, %v1072_v59  ;;  %v1084_v29 = vmul.f32 %v2070_v0, %v2888_v25  ;;  %v822_v39 = vpop.xlane.xlu0 %821  ;;  %v1301_v12 = vsel %vm2942_vm10, %v2872_v13, %v1297_v53  ;;  %vm1089_vm12 = vweird.f32 %v2070_v0 }
 0x210   : > { %v2948_v35 = vpop.eup %2071  ;;  %v2951_v58 = vpop.xlane.xlu1 %937  ;;  %v855_v19 = vsub.f32 %v2586_v26, %v822_v39  ;;  %v1306_v2 = vsel %vm2937_vm9, %v1305_v7, %v1301_v12  ;;  %v1095_v6 = vor.u32 1.1754944e-38, %v1094_v8  ;;  %vm2990_vm2 = vmor %vm1088_vm13, %vm1089_vm12  ;;  %vm2995_vm3 = vcmp.eq.f32.partialorder %v1316_v44, 8.507059e+37 }
 0x211   : > { %v1308_v17 = vmul.f32 %v2948_v35, %v2890_v32  ;;  %2075 = vrcp.f32 %v2951_v58  ;;  %v2966_v60 = vpop.xlane.xlu2 %969  ;;  %v1077_v14 = vsel %vm1076_vm11, %v2884_v1, %v1073_v3  ;;  %v1085_v21 = vsub.f32 1.0, %v1084_v29 }
 0x212   : > { %2077 = vrcp.f32 %v2966_v60  ;;  %v1082_v13 = vsel %vm2930_vm7, %v1081_v61, %v1077_v14  ;;  %v917_v4 = vmul.f32 1.442695, %v855_v19  ;;  %v1455_v48 = vmul.f32 %v2559_v46, %v1306_v2 }
 0x213   : > { %v1309_v54 = vsub.f32 1.0, %v1308_v17  ;;  %v1439_v26 = vmul.f32 %v2561_v47, %v1082_v13  ;;  %v1086_v50 = vmul.f32 %v2070_v0, %v1085_v21  ;;  %vm1313_vm1 = vweird.f32 %v2948_v35 }
 0x214   : > { %v2976_v30 = vpop.eup %2073  ;;  %2079 = vpow2.f32 %v917_v4  ;;  %1487 = vst [vmem:[%s2650_s22 + $0xb0] sm:$0xff] %v1455_v48  ;;  %v1319_v28 = vor.u32 1.1754944e-38, %v1318_v15  ;;  %v1106_v23 = vand.u32 2147483647, %v2951_v58  ;;  %v1108_v62 = vand.u32 2147483648, %v2951_v58  ;;  %vm1314_vm4 = vmor %vm1312_vm14, %vm1313_vm1 }
 0x215   : > { %v1310_v1 = vmul.f32 %v2948_v35, %v1309_v54  ;;  %1471 = vst [vmem:[%s2650_s22 + $0x30] sm:$0xff] %v1439_v26  ;;  %1531 = vmatmul.f32.gmra.mxu2 %v1439_v26  ;;  %949 = vadd.xlane.f32.xlu0 %v2976_v30  ;;  %v1087_v47 = vadd.f32 %v2070_v0, %v1086_v50  ;;  %v1330_v59 = vand.u32 2147483647, %v2966_v60  ;;  %vm1102_vm7 = vweird.f32 %v2951_v58 }
 0x216   : > { %1596 = vmatmul.f32.gmra.mxu3 %v1455_v48  ;;  %v1109_v15 = vor.u32 1.1754944e-38, %v1108_v62  ;;  %vm1326_vm9 = vweird.f32 %v2966_v60  ;;  %vm1107_vm10 = vcmp.eq.f32.partialorder %v1106_v23, 8.507059e+37 }
 0x217   : > { %v2076_v34 = vpop.eup %2075  ;;  %v1311_v25 = vadd.f32 %v2948_v35, %v1310_v1  ;;  %v792_v49 = vpop.xlane.xlu0 %791  ;;  %v1091_v43 = vsel %vm2990_vm2, %v2070_v0, %v1087_v47  ;;  %vm1331_vm12 = vcmp.eq.f32.partialorder %v1330_v59, 8.507059e+37 }
 0x218   : > { %v2078_v5 = vpop.eup %2077  ;;  %v1098_v11 = vmul.f32 %v2076_v34, %v2951_v58  ;;  %v824_v45 = vpop.xlane.xlu1 %823  ;;  %v840_v41 = vsub.f32 %v2598_v36, %v792_v49  ;;  %v1096_v3 = vsel %vm2984_vm15, %v1095_v6, %v1091_v43  ;;  %vm1103_vm5 = vweird.f32 %v2076_v34 }
 0x219   : > { %v1322_v18 = vmul.f32 %v2078_v5, %v2966_v60  ;;  %v856_v61 = vsub.f32 %v2600_v37, %v824_v45  ;;  %v3007_v53 = vpop.xlane.xlu2 %939  ;;  %v1440_v63 = vmul.f32 %v2578_v20, %v1096_v3  ;;  %v1315_v7 = vsel %vm1314_vm4, %v2948_v35, %v1311_v25  ;;  %vm3029_vm8 = vmor %vm1102_vm7, %vm1103_vm5 }
 0x21a   : > { %v1099_v0 = vsub.f32 1.0, %v1098_v11  ;;  %2081 = vrcp.f32 %v3007_v53  ;;  %v3019_v37 = vpop.eup %2079  ;;  %v887_v8 = vmul.f32 1.442695, %v840_v41  ;;  %v1320_v29 = vsel %vm2995_vm3, %v1319_v28, %v1315_v7 }
 0x21b   : > { %v1323_v51 = vsub.f32 1.0, %v1322_v18  ;;  %v919_v36 = vmul.f32 1.442695, %v856_v61  ;;  %1472 = vst [vmem:[%s2650_s22 + $0x38] sm:$0xff] %v1440_v63  ;;  %981 = vadd.xlane.f32.xlu1 %v3019_v37  ;;  %v1456_v32 = vmul.f32 %v2573_v16, %v1320_v29  ;;  %v1332_v20 = vand.u32 2147483648, %v2966_v60 }
 0x21c   : > { %v1100_v39 = vmul.f32 %v2076_v34, %v1099_v0  ;;  %vm1327_vm6 = vweird.f32 %v2078_v5  ;;  %v1122_v46 = vand.u32 2147483648, %v3007_v53  ;;  %vm1116_vm14 = vweird.f32 %v3007_v53 }
 0x21d   : > { %v1324_v12 = vmul.f32 %v2078_v5, %v1323_v51  ;;  %2083 = vpow2.f32 %v919_v36  ;;  %1534 = vmatmul.f32.gmra.mxu2 %v1440_v63  ;;  %1488 = vst [vmem:[%s2650_s22 + $0xb8] sm:$0xff] %v1456_v32  ;;  %vm1328_vm11 = vmor %vm1326_vm9, %vm1327_vm6  ;;  %v1333_v58 = vor.u32 1.1754944e-38, %v1332_v20 }
 0x21e   : > { %2085 = vpow2.f32 %v887_v8  ;;  %1599 = vmatmul.f32.gmra.mxu3 %v1456_v32  ;;  %v1101_v35 = vadd.f32 %v2076_v34, %v1100_v39  ;;  %v1123_v22 = vor.u32 1.1754944e-38, %v1122_v46 }
 0x21f   : > { %v1325_v17 = vadd.f32 %v2078_v5, %v1324_v12  ;;  %v3036_v14 = vpop.xlane.xlu0 %971 }
 0x220   : > { %v2082_v16 = vpop.eup %2081  ;;  %v3034_v19 = vpop.xlane.xlu1 %941  ;;  %v1105_v21 = vsel %vm3029_vm8, %v2076_v34, %v1101_v35  ;;  %v1346_v0 = vand.u32 2147483648, %v3036_v14  ;;  %vm1340_vm7 = vweird.f32 %v3036_v14 }
 0x221   : > { %v1112_v13 = vmul.f32 %v2082_v16, %v3007_v53  ;;  %2087 = vrcp.f32 %v3034_v19  ;;  %v3043_v2 = vpop.xlane.xlu2 %973  ;;  %v1110_v60 = vsel %vm1107_vm10, %v1109_v15, %v1105_v21  ;;  %v1329_v54 = vsel %vm1328_vm11, %v2078_v5, %v1325_v17 }
 0x222   : > { %2089 = vrcp.f32 %v3043_v2  ;;  %v1441_v4 = vmul.f32 %v2588_v31, %v1110_v60  ;;  %v1334_v26 = vsel %vm1331_vm12, %v1333_v58, %v1329_v54  ;;  %vm1117_vm13 = vweird.f32 %v2082_v16 }
 0x223   : > { %v3047_v48 = vpop.eup %2083  ;;  %v1113_v50 = vsub.f32 1.0, %v1112_v13  ;;  %2091 = vrcp.f32 %v3036_v14  ;;  %v1457_v1 = vmul.f32 %v2590_v33, %v1334_v26  ;;  %v1120_v31 = vand.u32 2147483647, %v3007_v53  ;;  %vm1118_vm15 = vmor %vm1116_vm14, %vm1117_vm13 }
 0x224   : > { %v3051_v47 = vpop.eup %2085  ;;  %1473 = vst [vmem:[%s2650_s22 + $0x40] sm:$0xff] %v1441_v4  ;;  %983 = vadd.xlane.f32.xlu0 %v3047_v48  ;;  %vm1130_vm2 = vweird.f32 %v3034_v19  ;;  %v1134_v59 = vand.u32 2147483647, %v3034_v19  ;;  %v1136_v18 = vand.u32 2147483648, %v3034_v19  ;;  %v1360_v41 = vand.u32 2147483648, %v3043_v2 }
 0x225   : > { %v1114_v6 = vmul.f32 %v2082_v16, %v1113_v50  ;;  %1537 = vmatmul.f32.gmra.mxu2 %v1441_v4  ;;  %1489 = vst [vmem:[%s2650_s22 + $0xc0] sm:$0xff] %v1457_v1  ;;  %951 = vadd.xlane.f32.xlu2 %v3051_v47  ;;  %vm1121_vm1 = vcmp.eq.f32.partialorder %v1120_v31, 8.507059e+37  ;;  %v1358_v63 = vand.u32 2147483647, %v3043_v2  ;;  %vm1354_vm8 = vweird.f32 %v3043_v2 }
 0x226   : > { %1602 = vmatmul.f32.gmra.mxu3 %v1457_v1  ;;  %v1137_v36 = vor.u32 1.1754944e-38, %v1136_v18  ;;  %vm1135_vm9 = vcmp.eq.f32.partialorder %v1134_v59, 8.507059e+37  ;;  %v1361_v32 = vor.u32 1.1754944e-38, %v1360_v41  ;;  %v1347_v12 = vor.u32 1.1754944e-38, %v1346_v0 }
 0x227   : > { %v2088_v34 = vpop.eup %2087  ;;  %v1115_v38 = vadd.f32 %v2082_v16, %v1114_v6  ;;  %vm1359_vm12 = vcmp.eq.f32.partialorder %v1358_v63, 8.507059e+37 }
 0x228   : > { %v2090_v33 = vpop.eup %2089  ;;  %v1126_v25 = vmul.f32 %v2088_v34, %v3034_v19  ;;  %vm1131_vm3 = vweird.f32 %v2088_v34 }
 0x229   : > { %v2092_v28 = vpop.eup %2091  ;;  %v1350_v23 = vmul.f32 %v2090_v33, %v3043_v2  ;;  %v1119_v5 = vsel %vm1118_vm15, %v2082_v16, %v1115_v38  ;;  %vm1355_vm4 = vweird.f32 %v2090_v33  ;;  %vm1132_vm6 = vmor %vm1130_vm2, %vm1131_vm3 }
 0x22a   : > { %v1127_v11 = vsub.f32 1.0, %v1126_v25  ;;  %v1336_v45 = vmul.f32 %v2092_v28, %v3036_v14  ;;  %v1124_v49 = vsel %vm1121_vm1, %v1123_v22, %v1119_v5  ;;  %vm1341_vm5 = vweird.f32 %v2092_v28  ;;  %vm1356_vm10 = vmor %vm1354_vm8, %vm1355_vm4 }
 0x22b   : > { %v1351_v43 = vsub.f32 1.0, %v1350_v23  ;;  %v1442_v62 = vmul.f32 %v2602_v55, %v1124_v49  ;;  %v1344_v55 = vand.u32 2147483647, %v3036_v14  ;;  %vm1342_vm11 = vmor %vm1340_vm7, %vm1341_vm5 }
 0x22c   : > { %v1128_v61 = vmul.f32 %v2088_v34, %v1127_v11  ;;  %v1337_v53 = vsub.f32 1.0, %v1336_v45 }
 0x22d   : > { %v1352_v3 = vmul.f32 %v2090_v33, %v1351_v43  ;;  %1474 = vst [vmem:[%s2650_s22 + $0x48] sm:$0xff] %v1442_v62  ;;  %1540 = vmatmul.f32.gmra.mxu2 %v1442_v62  ;;  %vm1345_vm13 = vcmp.eq.f32.partialorder %v1344_v55, 8.507059e+37 }
 0x22e   : > { %v1338_v7 = vmul.f32 %v2092_v28, %v1337_v53  ;;  %v1129_v51 = vadd.f32 %v2088_v34, %v1128_v61 }
 0x22f   : > { %v1353_v8 = vadd.f32 %v2090_v33, %v1352_v3 }
 0x230   : > { %v1133_v29 = vsel %vm1132_vm6, %v2088_v34, %v1129_v51  ;;  %v1339_v39 = vadd.f32 %v2092_v28, %v1338_v7 }
 0x231   : > { %v1138_v20 = vsel %vm1135_vm9, %v1137_v36, %v1133_v29  ;;  %v1357_v35 = vsel %vm1356_vm10, %v2090_v33, %v1353_v8 }
 0x232   : > { %v1443_v44 = vmul.f32 %v2611_v57, %v1138_v20  ;;  %v1343_v15 = vsel %vm1342_vm11, %v2092_v28, %v1339_v39  ;;  %v1362_v17 = vsel %vm1359_vm12, %v1361_v32, %v1357_v35 }
 0x233   : > { %v1348_v16 = vsel %vm1345_vm13, %v1347_v12, %v1343_v15  ;;  %v1459_v19 = vmul.f32 %v2615_v40, %v1362_v17 }
 0x234   : > { %1475 = vst [vmem:[%s2650_s22 + $0x50] sm:$0xff] %v1443_v44  ;;  %v1458_v14 = vmul.f32 %v2609_v56, %v1348_v16 }
 0x235   : > { %1543 = vmatmul.f32.gmra.mxu2 %v1443_v44  ;;  %1491 = vst [vmem:[%s2650_s22 + $0xd0] sm:$0xff] %v1459_v19 }
 0x236   : > { %1490 = vst [vmem:[%s2650_s22 + $0xc8] sm:$0xff] %v1458_v14  ;;  %1605 = vmatmul.f32.gmra.mxu3 %v1458_v14 }
 0x23e   : > { %1608 = vmatmul.f32.gmra.mxu3 %v1459_v19 }
 0x24e   : > { %v944_v21 = vpop.xlane.xlu0 %943 }
 0x24f   : > { %2093 = vrcp.f32 %v944_v21  ;;  %v1150_v2 = vand.u32 2147483648, %v944_v21  ;;  %v1148_v54 = vand.u32 2147483647, %v944_v21  ;;  %vm1144_vm15 = vweird.f32 %v944_v21 }
 0x251   : > { %v1151_v40 = vor.u32 1.1754944e-38, %v1150_v2  ;;  %vm1149_vm2 = vcmp.eq.f32.partialorder %v1148_v54, 8.507059e+37 }
 0x255   : > { %v2094_v58 = vpop.eup %2093 }
 0x256   : > { %v1140_v13 = vmul.f32 %v2094_v58, %v944_v21  ;;  %vm1145_vm14 = vweird.f32 %v2094_v58 }
 0x257   : > { %vm1146_vm1 = vmor %vm1144_vm15, %vm1145_vm14 }
 0x258   : > { %v1141_v57 = vsub.f32 1.0, %v1140_v13 }
 0x25a   : > { %v1142_v60 = vmul.f32 %v2094_v58, %v1141_v57 }
 0x25c   : > { %v1143_v56 = vadd.f32 %v2094_v58, %v1142_v60 }
 0x25e   : > { %v1514_v4 = vpop.f32.mrf.mxu2  ;;  %v976_v26 = vpop.xlane.xlu1 %975  ;;  %v1147_v50 = vsel %vm1146_vm1, %v2094_v58, %v1143_v56 }
 0x25f   : > { %1627 = vst.msk [vmem:[%s3086_s29] sm:$0xff] %vm438_vm0, %v1514_v4  ;;  %2095 = vrcp.f32 %v976_v26  ;;  %v1152_v1 = vsel %vm1149_vm2, %v1151_v40, %v1147_v50  ;;  %v1374_v25 = vand.u32 2147483648, %v976_v26  ;;  %v1372_v28 = vand.u32 2147483647, %v976_v26 }
 0x260   : > { %v1444_v46 = vmul.f32 %v2648_v9, %v1152_v1  ;;  %vm1368_vm4 = vweird.f32 %v976_v26 }
 0x261   : > { %v1375_v5 = vor.u32 1.1754944e-38, %v1374_v25  ;;  %vm1373_vm6 = vcmp.eq.f32.partialorder %v1372_v28, 8.507059e+37 }
 0x262   : > { %1476 = vst [vmem:[%s2650_s22 + $0x58] sm:$0xff] %v1444_v46  ;;  %1546 = vmatmul.f32.gmra.mxu2 %v1444_v46 }
 0x265   : > { %v2096_v6 = vpop.eup %2095 }
 0x266   : > { %v1364_v31 = vmul.f32 %v2096_v6, %v976_v26  ;;  %v1579_v34 = vpop.f32.mrf.mxu3  ;;  %vm1369_vm3 = vweird.f32 %v2096_v6 }
 0x267   : > { %v978_v38 = vpop.xlane.xlu0 %977  ;;  %1643 = vst.msk [vmem:[%s3086_s29 + $0x80] sm:$0xff] %vm438_vm0, %v1579_v34  ;;  %vm1370_vm5 = vmor %vm1368_vm4, %vm1369_vm3 }
 0x268   : > { %2097 = vrcp.f32 %v978_v38  ;;  %v1365_v33 = vsub.f32 1.0, %v1364_v31  ;;  %v1388_v61 = vand.u32 2147483648, %v978_v38  ;;  %v1386_v41 = vand.u32 2147483647, %v978_v38 }
 0x269   : > { %vm1382_vm8 = vweird.f32 %v978_v38 }
 0x26a   : > { %v1366_v22 = vmul.f32 %v2096_v6, %v1365_v33  ;;  %v1389_v0 = vor.u32 1.1754944e-38, %v1388_v61  ;;  %vm1387_vm10 = vcmp.eq.f32.partialorder %v1386_v41, 8.507059e+37 }
 0x26c   : > { %v1367_v23 = vadd.f32 %v2096_v6, %v1366_v22 }
 0x26e   : > { %v2098_v9 = vpop.eup %2097  ;;  %v1517_v45 = vpop.f32.mrf.mxu2  ;;  %v1371_v49 = vsel %vm1370_vm5, %v2096_v6, %v1367_v23 }
 0x26f   : > { %v1378_v11 = vmul.f32 %v2098_v9, %v978_v38  ;;  %1628 = vst.msk [vmem:[%s3086_s29 + $0x8] sm:$0xff] %vm438_vm0, %v1517_v45  ;;  %v1376_v43 = vsel %vm1373_vm6, %v1375_v5, %v1371_v49  ;;  %v1582_v59 = vpop.f32.mrf.mxu3  ;;  %vm1383_vm7 = vweird.f32 %v2098_v9 }
 0x270   : > { %v1460_v18 = vmul.f32 %v2702_v42, %v1376_v43  ;;  %1644 = vst.msk [vmem:[%s3086_s29 + $0x88] sm:$0xff] %vm438_vm0, %v1582_v59  ;;  %vm1384_vm9 = vmor %vm1382_vm8, %vm1383_vm7 }
 0x271   : > { %v1379_v62 = vsub.f32 1.0, %v1378_v11 }
 0x272   : > { %1492 = vst [vmem:[%s2650_s22 + $0xd8] sm:$0xff] %v1460_v18  ;;  %1611 = vmatmul.f32.gmra.mxu3 %v1460_v18 }
 0x273   : > { %v1380_v53 = vmul.f32 %v2098_v9, %v1379_v62 }
 0x275   : > { %v1381_v3 = vadd.f32 %v2098_v9, %v1380_v53 }
 0x276   : > { %v946_v7 = vpop.xlane.xlu2 %945 }
 0x277   : > { %v1520_v63 = vpop.f32.mrf.mxu2  ;;  %v1385_v51 = vsel %vm1384_vm9, %v2098_v9, %v1381_v3  ;;  %2099 = vrcp.f32 %v946_v7  ;;  %v1164_v44 = vand.u32 2147483648, %v946_v7  ;;  %vm1158_vm12 = vweird.f32 %v946_v7 }
 0x278   : > { %1629 = vst.msk [vmem:[%s3086_s29 + $0x10] sm:$0xff] %vm438_vm0, %v1520_v63  ;;  %v1390_v42 = vsel %vm1387_vm10, %v1389_v0, %v1385_v51  ;;  %v1585_v55 = vpop.f32.mrf.mxu3 }
 0x279   : > { %v1461_v36 = vmul.f32 %v2750_v27, %v1390_v42  ;;  %1645 = vst.msk [vmem:[%s3086_s29 + $0x90] sm:$0xff] %vm438_vm0, %v1585_v55  ;;  %v1162_v27 = vand.u32 2147483647, %v946_v7  ;;  %v1165_v19 = vor.u32 1.1754944e-38, %v1164_v44 }
 0x27b   : > { %1493 = vst [vmem:[%s2650_s22 + $0xe0] sm:$0xff] %v1461_v36  ;;  %1614 = vmatmul.f32.gmra.mxu3 %v1461_v36  ;;  %vm1163_vm14 = vcmp.eq.f32.partialorder %v1162_v27, 8.507059e+37 }
 0x27d   : > { %v2100_v8 = vpop.eup %2099 }
 0x27e   : > { %v1154_v29 = vmul.f32 %v2100_v8, %v946_v7  ;;  %v980_v32 = vpop.xlane.xlu2 %979  ;;  %vm1159_vm11 = vweird.f32 %v2100_v8 }
 0x27f   : > { %v948_v39 = vpop.xlane.xlu1 %947  ;;  %vm1160_vm13 = vmor %vm1158_vm12, %vm1159_vm11  ;;  %v1402_v6 = vand.u32 2147483648, %v980_v32  ;;  %v1400_v34 = vand.u32 2147483647, %v980_v32  ;;  %vm1396_vm4 = vweird.f32 %v980_v32 }
 0x280   : > { %v1523_v20 = vpop.f32.mrf.mxu2  ;;  %2101 = vrcp.f32 %v948_v39  ;;  %v1155_v12 = vsub.f32 1.0, %v1154_v29  ;;  %v1588_v35 = vpop.f32.mrf.mxu3  ;;  %v1178_v50 = vand.u32 2147483648, %v948_v39  ;;  %v1176_v46 = vand.u32 2147483647, %v948_v39 }
 0x281   : > { %1630 = vst.msk [vmem:[%s3086_s29 + $0x18] sm:$0xff] %vm438_vm0, %v1523_v20  ;;  %2103 = vrcp.f32 %v980_v32  ;;  %vm1172_vm1 = vweird.f32 %v948_v39  ;;  %v1403_v5 = vor.u32 1.1754944e-38, %v1402_v6  ;;  %vm1401_vm7 = vcmp.eq.f32.partialorder %v1400_v34, 8.507059e+37 }
 0x282   : > { %1646 = vst.msk [vmem:[%s3086_s29 + $0x98] sm:$0xff] %vm438_vm0, %v1588_v35  ;;  %v1156_v15 = vmul.f32 %v2100_v8, %v1155_v12  ;;  %v1179_v28 = vor.u32 1.1754944e-38, %v1178_v50  ;;  %vm1177_vm5 = vcmp.eq.f32.partialorder %v1176_v46, 8.507059e+37 }
 0x284   : > { %v1157_v17 = vadd.f32 %v2100_v8, %v1156_v15 }
 0x286   : > { %v2102_v16 = vpop.eup %2101  ;;  %v1161_v58 = vsel %vm1160_vm13, %v2100_v8, %v1157_v17 }
 0x287   : > { %v2104_v14 = vpop.eup %2103  ;;  %v1168_v21 = vmul.f32 %v2102_v16, %v948_v39  ;;  %v1166_v60 = vsel %vm1163_vm14, %v1165_v19, %v1161_v58  ;;  %vm1173_vm15 = vweird.f32 %v2102_v16 }
 0x288   : > { %v1392_v13 = vmul.f32 %v2104_v14, %v980_v32  ;;  %v1526_v57 = vpop.f32.mrf.mxu2  ;;  %v3110_v2 = vpop.xlane.xlu0 %949  ;;  %v1445_v40 = vmul.f32 %v2852_v24, %v1166_v60  ;;  %vm1397_vm2 = vweird.f32 %v2104_v14  ;;  %vm3119_vm3 = vmor %vm1172_vm1, %vm1173_vm15 }
 0x289   : > { %v1169_v54 = vsub.f32 1.0, %v1168_v21  ;;  %1631 = vst.msk [vmem:[%s3086_s29 + $0x20] sm:$0xff] %vm438_vm0, %v1526_v57  ;;  %v1591_v56 = vpop.f32.mrf.mxu3  ;;  %2105 = vrcp.f32 %v3110_v2  ;;  %vm1398_vm6 = vmor %vm1396_vm4, %vm1397_vm2  ;;  %v1192_v53 = vand.u32 2147483648, %v3110_v2  ;;  %v1190_v41 = vand.u32 2147483647, %v3110_v2 }
 0x28a   : > { %v1393_v4 = vsub.f32 1.0, %v1392_v13  ;;  %1647 = vst.msk [vmem:[%s3086_s29 + $0xa0] sm:$0xff] %vm438_vm0, %v1591_v56  ;;  %1549 = vmatmul.f32.gmra.mxu2 %v1445_v40  ;;  %vm1186_vm9 = vweird.f32 %v3110_v2 }
 0x28b   : > { %v1170_v26 = vmul.f32 %v2102_v16, %v1169_v54  ;;  %1477 = vst [vmem:[%s2650_s22 + $0x60] sm:$0xff] %v1445_v40  ;;  %v1193_v42 = vor.u32 1.1754944e-38, %v1192_v53  ;;  %vm1191_vm11 = vcmp.eq.f32.partialorder %v1190_v41, 8.507059e+37 }
 0x28c   : > { %v1394_v1 = vmul.f32 %v2104_v14, %v1393_v4 }
 0x28d   : > { %v1171_v31 = vadd.f32 %v2102_v16, %v1170_v26 }
 0x28e   : > { %v1395_v24 = vadd.f32 %v2104_v14, %v1394_v1  ;;  %v982_v25 = vpop.xlane.xlu1 %981 }
 0x28f   : > { %v2106_v33 = vpop.eup %2105  ;;  %v1175_v22 = vsel %vm3119_vm3, %v2102_v16, %v1171_v31  ;;  %2107 = vrcp.f32 %v982_v25  ;;  %v1416_v8 = vand.u32 2147483648, %v982_v25  ;;  %v1414_v20 = vand.u32 2147483647, %v982_v25 }
 0x290   : > { %v1182_v23 = vmul.f32 %v2106_v33, %v3110_v2  ;;  %v1529_v9 = vpop.f32.mrf.mxu2  ;;  %v1180_v45 = vsel %vm1177_vm5, %v1179_v28, %v1175_v22  ;;  %v1399_v49 = vsel %vm1398_vm6, %v2104_v14, %v1395_v24  ;;  %vm1187_vm8 = vweird.f32 %v2106_v33 }
 0x291   : > { %1632 = vst.msk [vmem:[%s3086_s29 + $0x28] sm:$0xff] %vm438_vm0, %v1529_v9  ;;  %v1594_v11 = vpop.f32.mrf.mxu3  ;;  %v1446_v62 = vmul.f32 %v2916_v52, %v1180_v45  ;;  %v1404_v59 = vsel %vm1401_vm7, %v1403_v5, %v1399_v49  ;;  %vm1188_vm10 = vmor %vm1186_vm9, %vm1187_vm8  ;;  %vm1410_vm13 = vweird.f32 %v982_v25  ;;  %v1417_v44 = vor.u32 1.1754944e-38, %v1416_v8 }
 0x292   : > { %v1183_v43 = vsub.f32 1.0, %v1182_v23  ;;  %1648 = vst.msk [vmem:[%s3086_s29 + $0xa8] sm:$0xff] %vm438_vm0, %v1594_v11  ;;  %v1462_v18 = vmul.f32 %v2911_v10, %v1404_v59  ;;  %vm1415_vm15 = vcmp.eq.f32.partialorder %v1414_v20, 8.507059e+37 }
 0x293   : > { %1478 = vst [vmem:[%s2650_s22 + $0x68] sm:$0xff] %v1446_v62  ;;  %1552 = vmatmul.f32.gmra.mxu2 %v1446_v62 }
 0x294   : > { %v1184_v61 = vmul.f32 %v2106_v33, %v1183_v43  ;;  %1494 = vst [vmem:[%s2650_s22 + $0xe8] sm:$0xff] %v1462_v18  ;;  %1617 = vmatmul.f32.gmra.mxu3 %v1462_v18 }
 0x295   : > { %v2108_v3 = vpop.eup %2107 }
 0x296   : > { %v1185_v0 = vadd.f32 %v2106_v33, %v1184_v61  ;;  %v1406_v52 = vmul.f32 %v2108_v3, %v982_v25  ;;  %vm1411_vm12 = vweird.f32 %v2108_v3 }
 0x297   : > { %v984_v63 = vpop.xlane.xlu0 %983  ;;  %vm1412_vm14 = vmor %vm1410_vm13, %vm1411_vm12 }
 0x298   : > { %v1532_v10 = vpop.f32.mrf.mxu2  ;;  %v952_v7 = vpop.xlane.xlu2 %951  ;;  %2109 = vrcp.f32 %v984_v63  ;;  %v1189_v51 = vsel %vm1188_vm10, %v2106_v33, %v1185_v0  ;;  %v1407_v55 = vsub.f32 1.0, %v1406_v52  ;;  %v1430_v57 = vand.u32 2147483648, %v984_v63 }
 0x299   : > { %1633 = vst.msk [vmem:[%s3086_s29 + $0x30] sm:$0xff] %vm438_vm0, %v1532_v10  ;;  %v1597_v36 = vpop.f32.mrf.mxu3  ;;  %2111 = vrcp.f32 %v952_v7  ;;  %v1194_v29 = vsel %vm1191_vm11, %v1193_v42, %v1189_v51  ;;  %v1206_v2 = vand.u32 2147483648, %v952_v7  ;;  %v1428_v54 = vand.u32 2147483647, %v984_v63 }
 0x29a   : > { %1649 = vst.msk [vmem:[%s3086_s29 + $0xb0] sm:$0xff] %vm438_vm0, %v1597_v36  ;;  %v1408_v39 = vmul.f32 %v2108_v3, %v1407_v55  ;;  %v1447_v32 = vmul.f32 %v2976_v30, %v1194_v29  ;;  %v1204_v40 = vand.u32 2147483647, %v952_v7  ;;  %vm1424_vm3 = vweird.f32 %v984_v63 }
 0x29b   : > { %vm1200_vm4 = vweird.f32 %v952_v7  ;;  %v1207_v50 = vor.u32 1.1754944e-38, %v1206_v2  ;;  %vm1429_vm7 = vcmp.eq.f32.partialorder %v1428_v54, 8.507059e+37 }
 0x29c   : > { %1479 = vst [vmem:[%s2650_s22 + $0x70] sm:$0xff] %v1447_v32  ;;  %1555 = vmatmul.f32.gmra.mxu2 %v1447_v32  ;;  %v1409_v12 = vadd.f32 %v2108_v3, %v1408_v39  ;;  %vm1205_vm8 = vcmp.eq.f32.partialorder %v1204_v40, 8.507059e+37 }
 0x29e   : > { %v2110_v35 = vpop.eup %2109  ;;  %v1413_v17 = vsel %vm1412_vm14, %v2108_v3, %v1409_v12 }
 0x29f   : > { %v2112_v15 = vpop.eup %2111  ;;  %v1420_v27 = vmul.f32 %v2110_v35, %v984_v63  ;;  %v1418_v14 = vsel %vm1415_vm15, %v1417_v44, %v1413_v17  ;;  %vm1425_vm1 = vweird.f32 %v2110_v35 }
 0x2a0   : > { %v1196_v16 = vmul.f32 %v2112_v15, %v952_v7  ;;  %v1535_v19 = vpop.f32.mrf.mxu2  ;;  %v1463_v58 = vmul.f32 %v3019_v37, %v1418_v14  ;;  %vm1201_vm2 = vweird.f32 %v2112_v15  ;;  %vm1426_vm5 = vmor %vm1424_vm3, %vm1425_vm1  ;;  %v1431_v37 = vor.u32 1.1754944e-38, %v1430_v57 }
 0x2a1   : > { %v1421_v21 = vsub.f32 1.0, %v1420_v27  ;;  %1634 = vst.msk [vmem:[%s3086_s29 + $0x38] sm:$0xff] %vm438_vm0, %v1535_v19  ;;  %v1600_v30 = vpop.f32.mrf.mxu3  ;;  %vm1202_vm6 = vmor %vm1200_vm4, %vm1201_vm2 }
 0x2a2   : > { %v1197_v13 = vsub.f32 1.0, %v1196_v16  ;;  %1650 = vst.msk [vmem:[%s3086_s29 + $0xb8] sm:$0xff] %vm438_vm0, %v1600_v30  ;;  %1620 = vmatmul.f32.gmra.mxu3 %v1463_v58 }
 0x2a3   : > { %v1422_v60 = vmul.f32 %v2110_v35, %v1421_v21  ;;  %1495 = vst [vmem:[%s2650_s22 + $0xf0] sm:$0xff] %v1463_v58 }
 0x2a4   : > { %v1198_v56 = vmul.f32 %v2112_v15, %v1197_v13 }
 0x2a5   : > { %v1423_v4 = vadd.f32 %v2110_v35, %v1422_v60 }
 0x2a6   : > { %v1199_v26 = vadd.f32 %v2112_v15, %v1198_v56 }
 0x2a7   : > { %v1427_v1 = vsel %vm1426_vm5, %v2110_v35, %v1423_v4 }
 0x2a8   : > { %v1538_v46 = vpop.f32.mrf.mxu2  ;;  %v1203_v6 = vsel %vm1202_vm6, %v2112_v15, %v1199_v26  ;;  %v1432_v31 = vsel %vm1429_vm7, %v1431_v37, %v1427_v1 }
 0x2a9   : > { %1635 = vst.msk [vmem:[%s3086_s29 + $0x40] sm:$0xff] %vm438_vm0, %v1538_v46  ;;  %v1603_v34 = vpop.f32.mrf.mxu3  ;;  %v1208_v38 = vsel %vm1205_vm8, %v1207_v50, %v1203_v6  ;;  %v1464_v24 = vmul.f32 %v3047_v48, %v1432_v31 }
 0x2aa   : > { %1651 = vst.msk [vmem:[%s3086_s29 + $0xc0] sm:$0xff] %vm438_vm0, %v1603_v34  ;;  %v1448_v33 = vmul.f32 %v3051_v47, %v1208_v38 }
 0x2ab   : > { %1496 = vst [vmem:[%s2650_s22 + $0xf8] sm:$0xff] %v1464_v24  ;;  %1623 = vmatmul.f32.gmra.mxu3 %v1464_v24 }
 0x2ac   : > { %1480 = vst [vmem:[%s2650_s22 + $0x78] sm:$0xff] %v1448_v33  ;;  %1558 = vmatmul.f32.gmra.mxu2 %v1448_v33 }
 0x2b0   : > { %v1541_v25 = vpop.f32.mrf.mxu2 }
 0x2b1   : > { %1636 = vst.msk [vmem:[%s3086_s29 + $0x48] sm:$0xff] %vm438_vm0, %v1541_v25 }
 0x2b2   : > { %2140 = shalt.err (!%p2137_p5)
}
 0x2b3   : > { %s2193_s14 = smov 128   ;;  %s2194_s22 = smov 8  }
 0x2b4   : > { %1928 = dma.vmem_to_hbm [thread:$0]  (%p2260_p4), %s1691_s8, 4096, %s1693_s9, %s1670_s10, %s2193_s14, %s2193_s14, %s2194_s22  }
 0x2b8   : > { %v1544_v48 = vpop.f32.mrf.mxu2 }
 0x2b9   : > { %1637 = vst.msk [vmem:[%s3086_s29 + $0x50] sm:$0xff] %vm438_vm0, %v1544_v48  ;;  %v1606_v47 = vpop.f32.mrf.mxu3 }
 0x2ba   : > { %1652 = vst.msk [vmem:[%s3086_s29 + $0xc8] sm:$0xff] %vm438_vm0, %v1606_v47 }
 0x2c1   : > { %v1609_v22 = vpop.f32.mrf.mxu3 }
 0x2c2   : > { %1653 = vst.msk [vmem:[%s3086_s29 + $0xd0] sm:$0xff] %vm438_vm0, %v1609_v22 }
 0x2e5   : > { %v1547_v28 = vpop.f32.mrf.mxu2 }
 0x2e6   : > { %1638 = vst.msk [vmem:[%s3086_s29 + $0x58] sm:$0xff] %vm438_vm0, %v1547_v28 }
 0x2f5   : > { %v1612_v23 = vpop.f32.mrf.mxu3 }
 0x2f6   : > { %1654 = vst.msk [vmem:[%s3086_s29 + $0xd8] sm:$0xff] %vm438_vm0, %v1612_v23 }
 0x2fe   : > { %v1615_v5 = vpop.f32.mrf.mxu3 }
 0x2ff   : > { %1655 = vst.msk [vmem:[%s3086_s29 + $0xe0] sm:$0xff] %vm438_vm0, %v1615_v5 }
 0x30d   : > { %v1550_v9 = vpop.f32.mrf.mxu2 }
 0x30e   : > { %1639 = vst.msk [vmem:[%s3086_s29 + $0x60] sm:$0xff] %vm438_vm0, %v1550_v9 }
 0x316   : > { %v1553_v11 = vpop.f32.mrf.mxu2 }
 0x317   : > { %1640 = vst.msk [vmem:[%s3086_s29 + $0x68] sm:$0xff] %vm438_vm0, %v1553_v11  ;;  %v1618_v45 = vpop.f32.mrf.mxu3 }
 0x318   : > { %1656 = vst.msk [vmem:[%s3086_s29 + $0xe8] sm:$0xff] %vm438_vm0, %v1618_v45 }
 0x31f   : > { %v1556_v49 = vpop.f32.mrf.mxu2 }
 0x320   : > { %1641 = vst.msk [vmem:[%s3086_s29 + $0x70] sm:$0xff] %vm438_vm0, %v1556_v49 }
 0x325   : > { %v1621_v43 = vpop.f32.mrf.mxu3 }
 0x326   : > { %1657 = vst.msk [vmem:[%s3086_s29 + $0xf0] sm:$0xff] %vm438_vm0, %v1621_v43 }
 0x32e   : > { %v1624_v62 = vpop.f32.mrf.mxu3 }
 0x32f   : > { %v1559_v59 = vpop.f32.mrf.mxu2  ;;  %1658 = vst.msk [vmem:[%s3086_s29 + $0xf8] sm:$0xff] %vm438_vm0, %v1624_v62 }
 0x330   : > { %1642 = vst.msk [vmem:[%s3086_s29 + $0x78] sm:$0xff] %vm438_vm0, %v1559_v59 }
 0x331 PF: > { %p1934_p4 = scmp.ge.s32.totalorder %s2191_s20, 2  ;;  %s1720_s25 = sand.u32 1, %s2171_s15  }
 0x332   : > { %s1721_s30 = scalar_lea.sflag [#allocation3], %s1720_s25 }
 0x333   : > { %p1931_p6 = pnand %p1934_p4, %p2267_p8 }
 0x335   : > { %p1932_p7 = pneg %p1931_p6 }
 0x337   : > { %2166 = dma.done.wait (%p1932_p7), %s1721_s30, 4096  }
 0x338   : > { %2168 = vsyncadd (%p1932_p7), %s1721_s30, 4294963200  ;;  %s18_s20 = sadd.s32 1, %s2191_s20   ;;  %s3279_s15 = smov %s2175_s16 }
 0x339   : > { %p15_p9 = scmp.ge.s32.totalorder %s18_s20, 4   ;;  %s3280_s16 = smov %s2179_s17 }
 0x33a   : > { %s3281_s17 = smov %s2273_s28  ;;  %s3282_s18 = smov %s2187_s19 }
 0x33b   : > { %s3283_s19 = smov %s3285_s23  ;;  %17 = sbr.rel (!%p15_p9) target bundleno = 4 (0x4), region = 85 }
 0x340   :  { %1727 = vsyncpa [#allocation3], 1 }
 0x341   :  { %1729 = vsyncpa [#allocation3 + $0x1], 1 }

</bundles_post_ra>
